<compile_context>
chip_gen: v5e
topology: v5e:2x2
jax: 0.10.0
libtpu: 0.0.40
codegen_flags: <defaults>
</compile_context>

<pallas_src>
import functools

import jax
import jax.numpy as jnp
from jax.experimental import pallas as pl
from jax.experimental.pallas import tpu as pltpu

D_IN, D_H, D_OUT, D_OUT_PAD = 784, 512, 10, 128


def _round_up(n, m):
    return ((n + m - 1) // m) * m


def _mlp_kernel(x_ref, w1_ref, b1_ref, w2_ref, b2_ref, w3_ref, b3_ref, o_ref):
    # Whole 3-layer forward for one batch tile; all weights resident in VMEM.
    # x / W are bf16, matmuls accumulate in f32 on the MXU, biases are f32.
    x = x_ref[...]                                                   # (tile, 784) bf16
    h1 = jnp.dot(x, w1_ref[...], preferred_element_type=jnp.float32) + b1_ref[...]
    h1 = jnp.maximum(h1, 0.0).astype(jnp.bfloat16)                   # (tile, 512)
    h2 = jnp.dot(h1, w2_ref[...], preferred_element_type=jnp.float32) + b2_ref[...]
    h2 = jnp.maximum(h2, 0.0).astype(jnp.bfloat16)                   # (tile, 512)
    h3 = jnp.dot(h2, w3_ref[...], preferred_element_type=jnp.float32) + b3_ref[...]
    o_ref[...] = jnp.maximum(h3, 0.0).astype(o_ref.dtype)            # (tile, 128)


@functools.partial(jax.jit, static_argnames=("batch_tile",))
def mlp_forward(x_nchw, params, *, batch_tile=256):
    """x_nchw: (B, 1, 28, 28) float32. Returns (B, 10) float32."""
    w1, b1, w2, b2, w3, b3 = params
    B = x_nchw.shape[0]
    x = x_nchw.reshape(B, D_IN)                       # x.view(-1, 784)

    # Sublane-aligned (multiple-of-8) batch tile, no bigger than the padded batch.
    tile = _round_up(min(batch_tile, _round_up(B, 8)), 8)
    # Prefer >=2 grid steps so ("parallel",) can shard across 2 TCs (v7x).
    if _round_up(B, tile) // tile < 2 and tile >= 16:
        tile = _round_up(tile // 2, 8)
    Bp = _round_up(B, tile)
    grid = (Bp // tile,)

    # Pad batch rows, cast x + weights to bf16, pad the last layer to 128 lanes.
    if Bp != B:
        x = jnp.pad(x, ((0, Bp - B), (0, 0)))
    x = x.astype(jnp.bfloat16)
    w1b = w1.astype(jnp.bfloat16)
    w2b = w2.astype(jnp.bfloat16)
    w3b = jnp.pad(w3, ((0, 0), (0, D_OUT_PAD - D_OUT))).astype(jnp.bfloat16)
    b3p = jnp.pad(b3, ((0, 0), (0, D_OUT_PAD - D_OUT)))

    flops = 2 * Bp * (D_IN * D_H + D_H * D_H + D_H * D_OUT_PAD)
    bytes_accessed = (
        Bp * D_IN * 2                                            # x (bf16)
        + (D_IN * D_H + D_H * D_H + D_H * D_OUT_PAD) * 2         # weights (bf16)
        + (D_H + D_H + D_OUT_PAD) * 4                            # biases (f32)
        + Bp * D_OUT_PAD * 4                                     # output (f32)
    )

    out = pl.pallas_call(
        _mlp_kernel,
        out_shape=jax.ShapeDtypeStruct((Bp, D_OUT_PAD), jnp.float32),
        grid_spec=pltpu.PrefetchScalarGridSpec(
            num_scalar_prefetch=0,
            grid=grid,
            in_specs=[
                pl.BlockSpec((tile, D_IN), lambda i: (i, 0)),        # x tile (bf16)
                pl.BlockSpec((D_IN, D_H), lambda i: (0, 0)),         # W1 (bf16)
                pl.BlockSpec((1, D_H), lambda i: (0, 0)),            # b1 (f32)
                pl.BlockSpec((D_H, D_H), lambda i: (0, 0)),          # W2 (bf16)
                pl.BlockSpec((1, D_H), lambda i: (0, 0)),            # b2 (f32)
                pl.BlockSpec((D_H, D_OUT_PAD), lambda i: (0, 0)),    # W3 padded (bf16)
                pl.BlockSpec((1, D_OUT_PAD), lambda i: (0, 0)),      # b3 padded (f32)
            ],
            out_specs=pl.BlockSpec((tile, D_OUT_PAD), lambda i: (i, 0)),
        ),
        compiler_params=pltpu.CompilerParams(
            dimension_semantics=("parallel",)),
        cost_estimate=pl.CostEstimate(
            flops=flops, transcendentals=0, bytes_accessed=bytes_accessed),
    )(x, w1b, b1, w2b, b2, w3b, b3p)

    return out[:B, :D_OUT]


def init_params(key):
    """Deterministic parameter init mimicking nn.Linear shapes.

    PyTorch Linear stores weight as (out, in); we keep the transposed (in, out)
    layout so the kernel does x @ W. Biases kept as (1, out) for 2D broadcast.
    """
    k1, k2, k3, k4, k5, k6 = jax.random.split(key, 6)

    def uniform_init(k, shape, fan_in):
        bound = 1.0 / jnp.sqrt(float(fan_in))
        return jax.random.uniform(k, shape, jnp.float32, -bound, bound)

    w1 = uniform_init(k1, (D_IN, D_H), D_IN)
    b1 = uniform_init(k2, (1, D_H), D_IN)
    w2 = uniform_init(k3, (D_H, D_H), D_H)
    b2 = uniform_init(k4, (1, D_H), D_H)
    w3 = uniform_init(k5, (D_H, D_OUT), D_H)
    b3 = uniform_init(k6, (1, D_OUT), D_H)
    return (w1, b1, w2, b2, w3, b3)


def mlp_reference(x_nchw, params):
    """Plain-JAX reference with the same bf16-matmul / f32-accumulate numerics."""
    w1, b1, w2, b2, w3, b3 = params
    x = x_nchw.reshape(x_nchw.shape[0], -1).astype(jnp.bfloat16)
    h1 = jax.nn.relu(
        jnp.dot(x, w1.astype(jnp.bfloat16), preferred_element_type=jnp.float32) + b1
    ).astype(jnp.bfloat16)
    h2 = jax.nn.relu(
        jnp.dot(h1, w2.astype(jnp.bfloat16), preferred_element_type=jnp.float32) + b2
    ).astype(jnp.bfloat16)
    h3 = jnp.dot(h2, w3.astype(jnp.bfloat16), preferred_element_type=jnp.float32) + b3
    return jax.nn.relu(h3)


if __name__ == "__main__":
    key = jax.random.PRNGKey(0)
    pkey, xkey = jax.random.split(key)
    params = init_params(pkey)

    # Small MNIST-shaped batch: (B=2, C=1, H=28, W=28), NCHW like PyTorch.
    x = jax.random.normal(xkey, (2, 1, 28, 28), dtype=jnp.float32)

    out = mlp_forward(x, params)
    out = jax.block_until_ready(out)

    ref = mlp_reference(x, params)
    assert out.shape == (2, 10)
    assert jnp.allclose(out, ref, atol=2e-3, rtol=2e-3), (
        f"max abs diff = {jnp.max(jnp.abs(out - ref))}")

    print("KERNEL_OK")
</pallas_src>

<mosaic_0001>
module attributes {stable_mosaic.version = 11 : i64} {
  func.func @_mlp_kernel(%arg0: i32, %arg1: memref<8x784xbf16, #tpu.memory_space<vmem>>, %arg2: memref<784x512xbf16, #tpu.memory_space<vmem>>, %arg3: memref<1x512xf32, #tpu.memory_space<vmem>>, %arg4: memref<512x512xbf16, #tpu.memory_space<vmem>>, %arg5: memref<1x512xf32, #tpu.memory_space<vmem>>, %arg6: memref<512x128xbf16, #tpu.memory_space<vmem>>, %arg7: memref<1x128xf32, #tpu.memory_space<vmem>>, %arg8: memref<8x128xf32, #tpu.memory_space<vmem>>) attributes {dimension_semantics = [#tpu.dimension_semantics<parallel>], iteration_bounds = array<i64: 1>, scalar_prefetch = 0 : i64, scratch_operands = 0 : i64, tpu.core_type = #tpu.core_type<tc>, window_params = [{transform_indices = @transform_0, window_bounds = array<i64: 8, 784>}, {pipeline_mode = #tpu.pipeline_mode<synchronous>, transform_indices = @transform_1, window_bounds = array<i64: 784, 512>}, {pipeline_mode = #tpu.pipeline_mode<synchronous>, transform_indices = @transform_2, window_bounds = array<i64: 1, 512>}, {pipeline_mode = #tpu.pipeline_mode<synchronous>, transform_indices = @transform_3, window_bounds = array<i64: 512, 512>}, {pipeline_mode = #tpu.pipeline_mode<synchronous>, transform_indices = @transform_4, window_bounds = array<i64: 1, 512>}, {pipeline_mode = #tpu.pipeline_mode<synchronous>, transform_indices = @transform_5, window_bounds = array<i64: 512, 128>}, {pipeline_mode = #tpu.pipeline_mode<synchronous>, transform_indices = @transform_6, window_bounds = array<i64: 1, 128>}, {transform_indices = @transform_7, window_bounds = array<i64: 8, 128>}]} {
    %c0 = arith.constant 0 : index
    %c0_0 = arith.constant 0 : index
    %0 = vector.load %arg1[%c0, %c0_0] : memref<8x784xbf16, #tpu.memory_space<vmem>>, vector<8x784xbf16>
    %c0_1 = arith.constant 0 : index
    %c0_2 = arith.constant 0 : index
    %1 = vector.load %arg2[%c0_1, %c0_2] : memref<784x512xbf16, #tpu.memory_space<vmem>>, vector<784x512xbf16>
    %cst = arith.constant dense<0.000000e+00> : vector<8x512xf32>
    %2 = tpu.matmul %0, %1, %cst {dimension_numbers = #tpu.dot_dimension_numbers<[1], [0], [0], [1], [0, 0, 1, 1], [], []>} : vector<8x784xbf16>, vector<784x512xbf16>, vector<8x512xf32> -> vector<8x512xf32>
    %c0_3 = arith.constant 0 : index
    %c0_4 = arith.constant 0 : index
    %3 = vector.load %arg3[%c0_3, %c0_4] : memref<1x512xf32, #tpu.memory_space<vmem>>, vector<1x512xf32>
    %4 = vector.broadcast %3 : vector<1x512xf32> to vector<8x512xf32>
    %5 = arith.addf %2, %4 : vector<8x512xf32>
    %cst_5 = arith.constant 0.000000e+00 : f32
    %6 = vector.broadcast %cst_5 : f32 to vector<8x512xf32>
    %7 = arith.maximumf %5, %6 : vector<8x512xf32>
    %8 = arith.truncf %7 : vector<8x512xf32> to vector<8x512xbf16>
    %c0_6 = arith.constant 0 : index
    %c0_7 = arith.constant 0 : index
    %9 = vector.load %arg4[%c0_6, %c0_7] : memref<512x512xbf16, #tpu.memory_space<vmem>>, vector<512x512xbf16>
    %cst_8 = arith.constant dense<0.000000e+00> : vector<8x512xf32>
    %10 = tpu.matmul %8, %9, %cst_8 {dimension_numbers = #tpu.dot_dimension_numbers<[1], [0], [0], [1], [0, 0, 1, 1], [], []>} : vector<8x512xbf16>, vector<512x512xbf16>, vector<8x512xf32> -> vector<8x512xf32>
    %c0_9 = arith.constant 0 : index
    %c0_10 = arith.constant 0 : index
    %11 = vector.load %arg5[%c0_9, %c0_10] : memref<1x512xf32, #tpu.memory_space<vmem>>, vector<1x512xf32>
    %12 = vector.broadcast %11 : vector<1x512xf32> to vector<8x512xf32>
    %13 = arith.addf %10, %12 : vector<8x512xf32>
    %cst_11 = arith.constant 0.000000e+00 : f32
    %14 = vector.broadcast %cst_11 : f32 to vector<8x512xf32>
    %15 = arith.maximumf %13, %14 : vector<8x512xf32>
    %16 = arith.truncf %15 : vector<8x512xf32> to vector<8x512xbf16>
    %c0_12 = arith.constant 0 : index
    %c0_13 = arith.constant 0 : index
    %17 = vector.load %arg6[%c0_12, %c0_13] : memref<512x128xbf16, #tpu.memory_space<vmem>>, vector<512x128xbf16>
    %cst_14 = arith.constant dense<0.000000e+00> : vector<8x128xf32>
    %18 = tpu.matmul %16, %17, %cst_14 {dimension_numbers = #tpu.dot_dimension_numbers<[1], [0], [0], [1], [0, 0, 1, 1], [], []>} : vector<8x512xbf16>, vector<512x128xbf16>, vector<8x128xf32> -> vector<8x128xf32>
    %c0_15 = arith.constant 0 : index
    %c0_16 = arith.constant 0 : index
    %19 = vector.load %arg7[%c0_15, %c0_16] : memref<1x128xf32, #tpu.memory_space<vmem>>, vector<1x128xf32>
    %20 = vector.broadcast %19 : vector<1x128xf32> to vector<8x128xf32>
    %21 = arith.addf %18, %20 : vector<8x128xf32>
    %cst_17 = arith.constant 0.000000e+00 : f32
    %22 = vector.broadcast %cst_17 : f32 to vector<8x128xf32>
    %23 = arith.maximumf %21, %22 : vector<8x128xf32>
    %c0_18 = arith.constant 0 : index
    %c0_19 = arith.constant 0 : index
    %24 = vector.load %arg8[%c0_18, %c0_19] : memref<8x128xf32, #tpu.memory_space<vmem>>, vector<8x128xf32>
    tpu.vector_store %arg8[%c0_18, %c0_19], %23 {strides = array<i32>} : memref<8x128xf32, #tpu.memory_space<vmem>>, vector<8x128xf32>,
    return
  }
  func.func @transform_0(%arg0: i32) -> (i32, i32) {
    %c0_i32 = arith.constant 0 : i32
    %c0_i32_0 = arith.constant 0 : i32
    return %arg0, %c0_i32 : i32, i32
  }
  func.func @transform_1(%arg0: i32) -> (i32, i32) {
    %c0_i32 = arith.constant 0 : i32
    %c0_i32_0 = arith.constant 0 : i32
    %c0_i32_1 = arith.constant 0 : i32
    return %c0_i32, %c0_i32_0 : i32, i32
  }
  func.func @transform_2(%arg0: i32) -> (i32, i32) {
    %c0_i32 = arith.constant 0 : i32
    %c0_i32_0 = arith.constant 0 : i32
    %c0_i32_1 = arith.constant 0 : i32
    return %c0_i32, %c0_i32_0 : i32, i32
  }
  func.func @transform_3(%arg0: i32) -> (i32, i32) {
    %c0_i32 = arith.constant 0 : i32
    %c0_i32_0 = arith.constant 0 : i32
    %c0_i32_1 = arith.constant 0 : i32
    return %c0_i32, %c0_i32_0 : i32, i32
  }
  func.func @transform_4(%arg0: i32) -> (i32, i32) {
    %c0_i32 = arith.constant 0 : i32
    %c0_i32_0 = arith.constant 0 : i32
    %c0_i32_1 = arith.constant 0 : i32
    return %c0_i32, %c0_i32_0 : i32, i32
  }
  func.func @transform_5(%arg0: i32) -> (i32, i32) {
    %c0_i32 = arith.constant 0 : i32
    %c0_i32_0 = arith.constant 0 : i32
    %c0_i32_1 = arith.constant 0 : i32
    return %c0_i32, %c0_i32_0 : i32, i32
  }
  func.func @transform_6(%arg0: i32) -> (i32, i32) {
    %c0_i32 = arith.constant 0 : i32
    %c0_i32_0 = arith.constant 0 : i32
    %c0_i32_1 = arith.constant 0 : i32
    return %c0_i32, %c0_i32_0 : i32, i32
  }
  func.func @transform_7(%arg0: i32) -> (i32, i32) {
    %c0_i32 = arith.constant 0 : i32
    %c0_i32_0 = arith.constant 0 : i32
    return %arg0, %c0_i32 : i32, i32
  }
}

</mosaic_0001>

<bundles_post_ra>
// kernel: mlp_forward.1
= control target key start
LH: loop header
LB: loop body
LE: loop exit
PB: predicated region body
PF: predicated region fallthrough
CT: control target
= control target key end

     0   :  { %vm1241_vm0 = vcmask 130048   ;;  %s6951_s1 = inlined_call_operand.vmem [shape: bf16[784,512], index: 1, kind: input, shape index: {}]   ;;  %s6952_s0 = inlined_call_operand.vmem [shape: bf16[8,784], index: 0, kind: input, shape index: {}]   ;;  %s6953_s2 = inlined_call_operand.vmem [shape: f32[1,512], index: 2, kind: input, shape index: {}]   ;;  %s6954_s3 = inlined_call_operand.vmem [shape: bf16[512,512], index: 3, kind: input, shape index: {}]   ;;  %s6955_s4 = inlined_call_operand.vmem [shape: f32[1,512], index: 4, kind: input, shape index: {}]   ;;  %s6956_s5 = inlined_call_operand.vmem [shape: bf16[512,128], index: 5, kind: input, shape index: {}]   ;;  %s6957_s6 = inlined_call_operand.vmem [shape: f32[1,128], index: 6, kind: input, shape index: {}]   ;;  %s6958_s7 = inlined_call_operand.vmem [shape: f32[8,128], index: 7, kind: output, shape index: {}]  }
   0x1   :  { %v3043_v0 = vld [vmem:[%s6951_s1 + $0xe0] sm:$0xf]  ;;  %v4387_v1 = vld [vmem:[%s6951_s1 + $0xec] sm:$0xf0] }
   0x2   :  { %v3171_v2 = vld [vmem:[%s6951_s1 + $0x1e0] sm:$0xf]  ;;  %v3044_v3 = vor.u32 %v4387_v1, %v3043_v0  ;;  %v4419_v4 = vld [vmem:[%s6951_s1 + $0x1ec] sm:$0xf0] }
   0x3   :  { %v3299_v5 = vld [vmem:[%s6951_s1 + $0x2e0] sm:$0xf]  ;;  %v4451_v6 = vld [vmem:[%s6951_s1 + $0x2ec] sm:$0xf0]  ;;  %v3172_v7 = vor.u32 %v4419_v4, %v3171_v2 }
   0x4   :  { %v3300_v8 = vor.u32 %v4451_v6, %v3299_v5  ;;  %v3427_v9 = vld [vmem:[%s6951_s1 + $0x3e0] sm:$0xf]  ;;  %v4483_v10 = vld [vmem:[%s6951_s1 + $0x3ec] sm:$0xf0]  ;;  %1245 = vmatpush.bf16.msra.mxu0 %v3044_v3 }
   0x5   :  { %v3027_v11 = vld [vmem:[%s6951_s1 + $0xc0] sm:$0xf]  ;;  %v3428_v12 = vor.u32 %v4483_v10, %v3427_v9  ;;  %v4383_v13 = vld [vmem:[%s6951_s1 + $0xcc] sm:$0xf0]  ;;  %1258 = vmatpush.bf16.msra.mxu1 %v3172_v7 }
   0x6   :  { %v3155_v14 = vld [vmem:[%s6951_s1 + $0x1c0] sm:$0xf]  ;;  %v4415_v15 = vld [vmem:[%s6951_s1 + $0x1cc] sm:$0xf0]  ;;  %1271 = vmatpush.bf16.msra.mxu2 %v3300_v8  ;;  %v3028_v16 = vor.u32 %v4383_v13, %v3027_v11 }
   0x7   :  { %v3156_v17 = vor.u32 %v4415_v15, %v3155_v14  ;;  %v3283_v18 = vld [vmem:[%s6951_s1 + $0x2c0] sm:$0xf]  ;;  %v4447_v19 = vld [vmem:[%s6951_s1 + $0x2cc] sm:$0xf0]  ;;  %1284 = vmatpush.bf16.msra.mxu3 %v3428_v12 }
   0x8   :  { %v3411_v20 = vld [vmem:[%s6951_s1 + $0x3c0] sm:$0xf]  ;;  %v3284_v21 = vor.u32 %v4447_v19, %v3283_v18  ;;  %v4479_v22 = vld [vmem:[%s6951_s1 + $0x3cc] sm:$0xf0]  ;;  %1246 = vmatpush.bf16.msra.mxu0 %v3028_v16 }
   0x9   :  { %v3011_v23 = vld [vmem:[%s6951_s1 + $0xa0] sm:$0xf]  ;;  %v4379_v24 = vld [vmem:[%s6951_s1 + $0xac] sm:$0xf0]  ;;  %v3412_v25 = vor.u32 %v4479_v22, %v3411_v20  ;;  %1259 = vmatpush.bf16.msra.mxu1 %v3156_v17 }
   0xa   :  { %v3139_v26 = vld [vmem:[%s6951_s1 + $0x1a0] sm:$0xf]  ;;  %v4411_v27 = vld [vmem:[%s6951_s1 + $0x1ac] sm:$0xf0]  ;;  %v3012_v29 = vor.u32 %v4379_v24, %v3011_v23  ;;  %1272 = vmatpush.bf16.msra.mxu2 %v3284_v21 }
   0xb   :  { %v3267_v28 = vld [vmem:[%s6951_s1 + $0x2a0] sm:$0xf]  ;;  %v4443_v30 = vld [vmem:[%s6951_s1 + $0x2ac] sm:$0xf0]  ;;  %v3140_v33 = vor.u32 %v4411_v27, %v3139_v26  ;;  %1285 = vmatpush.bf16.msra.mxu3 %v3412_v25  ;;  %v28_v25 = vld [vmem:[%s6952_s0 + $0x8] sm:$0xff] }
   0xc   :  { %v3395_v31 = vld [vmem:[%s6951_s1 + $0x3a0] sm:$0xf]  ;;  %v4475_v32 = vld [vmem:[%s6951_s1 + $0x3ac] sm:$0xf0]  ;;  %v3268_v34 = vor.u32 %v4443_v30, %v3267_v28  ;;  %1247 = vmatpush.bf16.msra.mxu0 %v3012_v29 }
   0xd   :  { %v2995_v35 = vld [vmem:[%s6951_s1 + $0x80] sm:$0xf]  ;;  %v4375_v36 = vld [vmem:[%s6951_s1 + $0x8c] sm:$0xf0]  ;;  %v3396_v38 = vor.u32 %v4475_v32, %v3395_v31  ;;  %1260 = vmatpush.bf16.msra.mxu1 %v3140_v33 }
   0xe   :  { %v3123_v37 = vld [vmem:[%s6951_s1 + $0x180] sm:$0xf]  ;;  %v4407_v39 = vld [vmem:[%s6951_s1 + $0x18c] sm:$0xf0]  ;;  %v2996_v44 = vor.u32 %v4375_v36, %v2995_v35  ;;  %1273 = vmatpush.bf16.msra.mxu2 %v3268_v34  ;;  %v4385_v34 = vld [vmem:[%s6951_s1 + $0xe4] sm:$0xf]  ;;  %v243_v36 = vunpack.c.l.b16 %v28_v25 }
   0xf   :  { %v3251_v40 = vld [vmem:[%s6951_s1 + $0x280] sm:$0xf]  ;;  %v4439_v41 = vld [vmem:[%s6951_s1 + $0x28c] sm:$0xf0]  ;;  %v3124_v45 = vor.u32 %v4407_v39, %v3123_v37  ;;  %1286 = vmatpush.bf16.msra.mxu3 %v3396_v38  ;;  %v3045_v35 = vld [vmem:[%s6951_s1 + $0xf0] sm:$0xf0] }
  0x10   :  { %v3379_v42 = vld [vmem:[%s6951_s1 + $0x380] sm:$0xf]  ;;  %v4471_v43 = vld [vmem:[%s6951_s1 + $0x38c] sm:$0xf0]  ;;  %v3252_v46 = vor.u32 %v4439_v41, %v3251_v40  ;;  %1248 = vmatpush.bf16.msra.mxu0 %v2996_v44 }
  0x11   :  { %v2979_v47 = vld [vmem:[%s6951_s1 + $0x60] sm:$0xf]  ;;  %v4371_v48 = vld [vmem:[%s6951_s1 + $0x6c] sm:$0xf0]  ;;  %v3380_v50 = vor.u32 %v4471_v43, %v3379_v42  ;;  %1261 = vmatpush.bf16.msra.mxu1 %v3124_v45  ;;  %v244_v42 = vunpack.c.h.b16 %v28_v25  ;;  %v4405_v25 = vld [vmem:[%s6951_s1 + $0x184] sm:$0xf] }
  0x12   :  { %v3107_v49 = vld [vmem:[%s6951_s1 + $0x160] sm:$0xf]  ;;  %v4403_v51 = vld [vmem:[%s6951_s1 + $0x16c] sm:$0xf0]  ;;  %v2980_v56 = vor.u32 %v4371_v48, %v2979_v47  ;;  %1274 = vmatpush.bf16.msra.mxu2 %v3252_v46  ;;  %v4417_v46 = vld [vmem:[%s6951_s1 + $0x1e4] sm:$0xf] }
  0x13   :  { %v3235_v52 = vld [vmem:[%s6951_s1 + $0x260] sm:$0xf]  ;;  %v4435_v53 = vld [vmem:[%s6951_s1 + $0x26c] sm:$0xf0]  ;;  %v3108_v57 = vor.u32 %v4403_v51, %v3107_v49  ;;  %1287 = vmatpush.bf16.msra.mxu3 %v3380_v50  ;;  %v3173_v47 = vld [vmem:[%s6951_s1 + $0x1f0] sm:$0xf0]  ;;  %v3048_v49 = vor.u32 %v4385_v34, %v3045_v35 }
  0x14   :  { %v3363_v54 = vld [vmem:[%s6951_s1 + $0x360] sm:$0xf]  ;;  %v4467_v55 = vld [vmem:[%s6951_s1 + $0x36c] sm:$0xf0]  ;;  %v3236_v58 = vor.u32 %v4435_v53, %v3235_v52  ;;  %1249 = vmatpush.bf16.msra.mxu0 %v2980_v56  ;;  %v4991_v53 = vpack.c.b16 %v243_v36, %v243_v36  ;;  %v3029_v56 = vld [vmem:[%s6951_s1 + $0xd0] sm:$0xf0] }
  0x15   :  { %v2963_v59 = vld [vmem:[%s6951_s1 + $0x40] sm:$0xf]  ;;  %v4367_v60 = vld [vmem:[%s6951_s1 + $0x4c] sm:$0xf0]  ;;  %v3364_v62 = vor.u32 %v4467_v55, %v3363_v54  ;;  %1262 = vmatpush.bf16.msra.mxu1 %v3108_v57  ;;  %v4381_v55 = vld [vmem:[%s6951_s1 + $0xc4] sm:$0xf] }
  0x16   :  { %v3091_v61 = vld [vmem:[%s6951_s1 + $0x140] sm:$0xf]  ;;  %v4399_v63 = vld [vmem:[%s6951_s1 + $0x14c] sm:$0xf0]  ;;  %v2964_v4 = vor.u32 %v4367_v60, %v2963_v59  ;;  %1275 = vmatpush.bf16.msra.mxu2 %v3236_v58  ;;  %v5004_v60 = vpack.c.b16 %v244_v42, %v244_v42  ;;  %v2981_v34 = vld [vmem:[%s6951_s1 + $0x70] sm:$0xf0] }
  0x17   :  { %v3219_v0 = vld [vmem:[%s6951_s1 + $0x240] sm:$0xf]  ;;  %v4431_v1 = vld [vmem:[%s6951_s1 + $0x24c] sm:$0xf0]  ;;  %v3092_v5 = vor.u32 %v4399_v63, %v3091_v61  ;;  %1288 = vmatpush.bf16.msra.mxu3 %v3364_v62  ;;  %v3176_v61 = vor.u32 %v4417_v46, %v3173_v47  ;;  %v4413_v63 = vld [vmem:[%s6951_s1 + $0x1c4] sm:$0xf] }
  0x18   :  { %v3347_v2 = vld [vmem:[%s6951_s1 + $0x340] sm:$0xf]  ;;  %v4463_v3 = vld [vmem:[%s6951_s1 + $0x34c] sm:$0xf0]  ;;  %v3220_v6 = vor.u32 %v4431_v1, %v3219_v0  ;;  %1250 = vmatpush.bf16.msra.mxu0 %v2964_v4  ;;  %v3157_v0 = vld [vmem:[%s6951_s1 + $0x1d0] sm:$0xf0] }
  0x19   :  { %v2947_v7 = vld [vmem:[%s6951_s1 + $0x20] sm:$0xf]  ;;  %v4363_v8 = vld [vmem:[%s6951_s1 + $0x2c] sm:$0xf0]  ;;  %v3348_v10 = vor.u32 %v4463_v3, %v3347_v2  ;;  %1263 = vmatpush.bf16.msra.mxu1 %v3092_v5  ;;  %v3032_v2 = vor.u32 %v4381_v55, %v3029_v56  ;;  %v4365_v46 = vld [vmem:[%s6951_s1 + $0x44] sm:$0xf] }
  0x1a   :  { %v3075_v9 = vld [vmem:[%s6951_s1 + $0x120] sm:$0xf]  ;;  %v4395_v11 = vld [vmem:[%s6951_s1 + $0x12c] sm:$0xf0]  ;;  %v2948_v17 = vor.u32 %v4363_v8, %v2947_v7  ;;  %1276 = vmatpush.bf16.msra.mxu2 %v3220_v6  ;;  %v4377_v7 = vld [vmem:[%s6951_s1 + $0xa4] sm:$0xf] }
  0x1b   :  { %v3203_v12 = vld [vmem:[%s6951_s1 + $0x220] sm:$0xf]  ;;  %v4427_v13 = vld [vmem:[%s6951_s1 + $0x22c] sm:$0xf0]  ;;  %v3076_v21 = vor.u32 %v4395_v11, %v3075_v9  ;;  %1289 = vmatpush.bf16.msra.mxu3 %v3348_v10  ;;  %v3013_v8 = vld [vmem:[%s6951_s1 + $0xb0] sm:$0xf0]  ;;  %v3160_v10 = vor.u32 %v4413_v63, %v3157_v0 }
  0x1c   :  { %v3331_v14 = vld [vmem:[%s6951_s1 + $0x320] sm:$0xf]  ;;  %v4459_v15 = vld [vmem:[%s6951_s1 + $0x32c] sm:$0xf0]  ;;  %v3204_v22 = vor.u32 %v4427_v13, %v3203_v12  ;;  %1251 = vmatpush.bf16.msra.mxu0 %v2948_v17  ;;  %v4409_v12 = vld [vmem:[%s6951_s1 + $0x1a4] sm:$0xf] }
  0x1d   :  { %v2931_v16 = vld [vmem:[%s6951_s1] sm:$0xf]  ;;  %v4359_v18 = vld [vmem:[%s6951_s1 + $0xc] sm:$0xf0]  ;;  %v3332_v26 = vor.u32 %v4459_v15, %v3331_v14  ;;  %1264 = vmatpush.bf16.msra.mxu1 %v3076_v21  ;;  %v3141_v13 = vld [vmem:[%s6951_s1 + $0x1b0] sm:$0xf0]  ;;  %v3016_v15 = vor.u32 %v4377_v7, %v3013_v8 }
  0x1e   :  { %v3059_v19 = vld [vmem:[%s6951_s1 + $0x100] sm:$0xf]  ;;  %v4391_v20 = vld [vmem:[%s6951_s1 + $0x10c] sm:$0xf0]  ;;  %v2932_v33 = vor.u32 %v4359_v18, %v2931_v16  ;;  %1277 = vmatpush.bf16.msra.mxu2 %v3204_v22  ;;  %v2997_v21 = vld [vmem:[%s6951_s1 + $0x90] sm:$0xf0] }
  0x1f   :  { %v3187_v23 = vld [vmem:[%s6951_s1 + $0x200] sm:$0xf]  ;;  %v4423_v24 = vld [vmem:[%s6951_s1 + $0x20c] sm:$0xf0]  ;;  %v3060_v38 = vor.u32 %v4391_v20, %v3059_v19  ;;  %1290 = vmatpush.bf16.msra.mxu3 %v3332_v26  ;;  %v4373_v20 = vld [vmem:[%s6951_s1 + $0x84] sm:$0xf] }
  0x20   :  { %v3315_v27 = vld [vmem:[%s6951_s1 + $0x300] sm:$0xf]  ;;  %v4455_v28 = vld [vmem:[%s6951_s1 + $0x30c] sm:$0xf0]  ;;  %v3188_v39 = vor.u32 %v4423_v24, %v3187_v23  ;;  %1252 = vmatpush.bf16.msra.mxu0 %v2932_v33  ;;  %v30_v22 = vld [vmem:[%s6952_s0 + $0x18] sm:$0xf]  ;;  %v3144_v23 = vor.u32 %v4409_v12, %v3141_v13 }
  0x21   :  { %v3555_v29 = vld [vmem:[%s6951_s1 + $0x4e0] sm:$0xf]  ;;  %v4515_v30 = vld [vmem:[%s6951_s1 + $0x4ec] sm:$0xf0]  ;;  %v3316_v43 = vor.u32 %v4455_v28, %v3315_v27  ;;  %1265 = vmatpush.bf16.msra.mxu1 %v3060_v38  ;;  %v3125_v26 = vld [vmem:[%s6951_s1 + $0x190] sm:$0xf0]  ;;  %v3000_v28 = vor.u32 %v4373_v20, %v2997_v21  ;;  %v247_v35 = vunpack.c.l.b16 %v30_v22 }
  0x22   :  { %v3683_v31 = vld [vmem:[%s6951_s1 + $0x5e0] sm:$0xf]  ;;  %v4547_v32 = vld [vmem:[%s6951_s1 + $0x5ec] sm:$0xf0]  ;;  %v3556_v44 = vor.u32 %v4515_v30, %v3555_v29  ;;  %1278 = vmatpush.bf16.msra.mxu2 %v3188_v39  ;;  %v4369_v33 = vld [vmem:[%s6951_s1 + $0x64] sm:$0xf]  ;;  %v3128_v36 = vor.u32 %v4405_v25, %v3125_v26 }
  0x23   :  { %v27_v37 = vld [vmem:[%s6952_s0] sm:$0xff]  ;;  %v4551_v45 = vld [vmem:[%s6951_s1 + $0x60c] sm:$0xf0]  ;;  %v3684_v48 = vor.u32 %v4547_v32, %v3683_v31  ;;  %1291 = vmatpush.bf16.msra.mxu3 %v3316_v43  ;;  %v3109_v39 = vld [vmem:[%s6951_s1 + $0x170] sm:$0xf0] }
  0x24   :  { %v3699_v40 = vld [vmem:[%s6951_s1 + $0x600] sm:$0xf]  ;;  %v241_v41 = vunpack.c.l.b16 %v27_v37  ;;  %v4511_v51 = vld [vmem:[%s6951_s1 + $0x4cc] sm:$0xf0]  ;;  %v242_v58 = vunpack.c.h.b16 %v27_v37  ;;  %1297 = vmatpush.bf16.msrb.mxu0 %v3556_v44  ;;  %v4401_v38 = vld [vmem:[%s6951_s1 + $0x164] sm:$0xf] }
  0x25   :  { %v3539_v50 = vld [vmem:[%s6951_s1 + $0x4c0] sm:$0xf]  ;;  %v4543_v54 = vld [vmem:[%s6951_s1 + $0x5cc] sm:$0xf0]  ;;  %v3700_v59 = vor.u32 %v4551_v45, %v3699_v40  ;;  %1310 = vmatpush.bf16.msrb.mxu1 %v3684_v48  ;;  %1279 = vmatmul.bf16.vlgmr.msra.gmra.mxu2 %v4991_v53  ;;  %v2965_v47 = vld [vmem:[%s6951_s1 + $0x50] sm:$0xf0]  ;;  %v5111_v48 = vpack.c.b16 %v247_v35, %v247_v35 }
  0x26   :  { %v3667_v52 = vld [vmem:[%s6951_s1 + $0x5c0] sm:$0xf]  ;;  %v5002_v57 = vpack.c.b16 %v241_v41, %v241_v41  ;;  %v3540_v62 = vor.u32 %v4511_v51, %v3539_v50  ;;  %v4507_v4 = vld [vmem:[%s6951_s1 + $0x4ac] sm:$0xf0]  ;;  %v5032_v9 = vpack.c.b16 %v242_v58, %v242_v58  ;;  %1292 = vmatmul.bf16.vlgmr.msra.gmra.mxu3 %v5004_v60  ;;  %v2984_v41 = vor.u32 %v4369_v33, %v2981_v34  ;;  %v4397_v51 = vld [vmem:[%s6951_s1 + $0x144] sm:$0xf] }
  0x27   :  { %1336 = vmatpush.bf16.msrb.mxu3 %v3048_v49  ;;  %v3668_v1 = vor.u32 %v4543_v54, %v3667_v52  ;;  %v3523_v3 = vld [vmem:[%s6951_s1 + $0x4a0] sm:$0xf]  ;;  %v4539_v6 = vld [vmem:[%s6951_s1 + $0x5ac] sm:$0xf0]  ;;  %1330 = vmatpush.bf16.msrb.mxu2 %v3700_v59  ;;  %v3112_v49 = vor.u32 %v4401_v38, %v3109_v39  ;;  %v3093_v52 = vld [vmem:[%s6951_s1 + $0x150] sm:$0xf0]  ;;  %v2968_v55 = vor.u32 %v4365_v46, %v2965_v47 }
  0x28   :  { %v3651_v5 = vld [vmem:[%s6951_s1 + $0x5a0] sm:$0xf]  ;;  %1253 = vmatmul.bf16.vlgmr.msra.gmra.mxu0 %v5002_v57  ;;  %v3524_v11 = vor.u32 %v4507_v4, %v3523_v3  ;;  %v4503_v17 = vld [vmem:[%s6951_s1 + $0x48c] sm:$0xf0]  ;;  %1266 = vmatmul.bf16.vlgmr.msra.gmra.mxu1 %v5032_v9  ;;  %v2949_v63 = vld [vmem:[%s6951_s1 + $0x30] sm:$0xf0] }
  0x29   :  { %1298 = vmatpush.bf16.msrb.mxu0 %v3540_v62  ;;  %1311 = vmatpush.bf16.msrb.mxu1 %v3668_v1  ;;  %v3652_v14 = vor.u32 %v4539_v6, %v3651_v5  ;;  %v3507_v16 = vld [vmem:[%s6951_s1 + $0x480] sm:$0xf]  ;;  %v4535_v19 = vld [vmem:[%s6951_s1 + $0x58c] sm:$0xf0]  ;;  %v4361_v62 = vld [vmem:[%s6951_s1 + $0x24] sm:$0xf]  ;;  %v3096_v1 = vor.u32 %v4397_v51, %v3093_v52 }
  0x2a   :  { %v3635_v18 = vld [vmem:[%s6951_s1 + $0x580] sm:$0xf]  ;;  %v3508_v24 = vor.u32 %v4503_v17, %v3507_v16  ;;  %v4499_v30 = vld [vmem:[%s6951_s1 + $0x46c] sm:$0xf0]  ;;  %v4393_v0 = vld [vmem:[%s6951_s1 + $0x124] sm:$0xf]  ;;  %v2952_v7 = vor.u32 %v4361_v62, %v2949_v63 }
  0x2b   :  { %1349 = vmatpush.bf16.msra.mxu2 %v3176_v61  ;;  %1337 = vmatpush.bf16.msrb.mxu3 %v3032_v2  ;;  %v3636_v27 = vor.u32 %v4535_v19, %v3635_v18  ;;  %v3491_v29 = vld [vmem:[%s6951_s1 + $0x460] sm:$0xf]  ;;  %v4531_v32 = vld [vmem:[%s6951_s1 + $0x56c] sm:$0xf0]  ;;  %v3077_v3 = vld [vmem:[%s6951_s1 + $0x130] sm:$0xf0] }
  0x2c   :  { %v3619_v31 = vld [vmem:[%s6951_s1 + $0x560] sm:$0xf]  ;;  %v3492_v37 = vor.u32 %v4499_v30, %v3491_v29  ;;  %v4495_v43 = vld [vmem:[%s6951_s1 + $0x44c] sm:$0xf0]  ;;  %v4357_v12 = vld [vmem:[%s6951_s1 + $0x4] sm:$0xf]  ;;  %v3080_v19 = vor.u32 %v4393_v0, %v3077_v3 }
  0x2d   :  { %1299 = vmatpush.bf16.msrb.mxu0 %v3524_v11  ;;  %1312 = vmatpush.bf16.msrb.mxu1 %v3652_v14  ;;  %v3620_v40 = vor.u32 %v4531_v32, %v3619_v31  ;;  %v3475_v42 = vld [vmem:[%s6951_s1 + $0x440] sm:$0xf]  ;;  %v4527_v45 = vld [vmem:[%s6951_s1 + $0x54c] sm:$0xf0]  ;;  %v2933_v13 = vld [vmem:[%s6951_s1 + $0x10] sm:$0xf0] }
  0x2e   :  { %v3603_v44 = vld [vmem:[%s6951_s1 + $0x540] sm:$0xf]  ;;  %v3476_v50 = vor.u32 %v4495_v43, %v3475_v42  ;;  %v4491_v58 = vld [vmem:[%s6951_s1 + $0x42c] sm:$0xf0]  ;;  %v4449_v14 = vld [vmem:[%s6951_s1 + $0x2e4] sm:$0xf]  ;;  %v2936_v25 = vor.u32 %v4357_v12, %v2933_v13 }
  0x2f   :  { %1350 = vmatpush.bf16.msra.mxu2 %v3160_v10  ;;  %1338 = vmatpush.bf16.msrb.mxu3 %v3016_v15  ;;  %v3604_v54 = vor.u32 %v4527_v45, %v3603_v44  ;;  %v3459_v56 = vld [vmem:[%s6951_s1 + $0x420] sm:$0xf]  ;;  %v4523_v61 = vld [vmem:[%s6951_s1 + $0x52c] sm:$0xf0]  ;;  %v3301_v15 = vld [vmem:[%s6951_s1 + $0x2f0] sm:$0xf0] }
  0x30   :  { %v3587_v59 = vld [vmem:[%s6951_s1 + $0x520] sm:$0xf]  ;;  %v3460_v2 = vor.u32 %v4491_v58, %v3459_v56  ;;  %v29_v5 = vld [vmem:[%s6952_s0 + $0x10] sm:$0xff]  ;;  %v4481_v16 = vld [vmem:[%s6951_s1 + $0x3e4] sm:$0xf] }
  0x31   :  { %1300 = vmatpush.bf16.msrb.mxu0 %v3508_v24  ;;  %1313 = vmatpush.bf16.msrb.mxu1 %v3636_v27  ;;  %v3443_v4 = vld [vmem:[%s6951_s1 + $0x400] sm:$0xf]  ;;  %v3588_v6 = vor.u32 %v4523_v61, %v3587_v59  ;;  %v4487_v8 = vld [vmem:[%s6951_s1 + $0x40c] sm:$0xf0]  ;;  %v3429_v17 = vld [vmem:[%s6951_s1 + $0x3f0] sm:$0xf0]  ;;  %v245_v18 = vunpack.c.l.b16 %v29_v5 }
  0x32   :  { %v3571_v10 = vld [vmem:[%s6951_s1 + $0x500] sm:$0xf]  ;;  %v4519_v11 = vld [vmem:[%s6951_s1 + $0x50c] sm:$0xf0]  ;;  %v3444_v20 = vor.u32 %v4487_v8, %v3443_v4  ;;  %v4513_v21 = vld [vmem:[%s6951_s1 + $0x4e4] sm:$0xf]  ;;  %v3432_v29 = vor.u32 %v4481_v16, %v3429_v17 }
  0x33   :  { %1351 = vmatpush.bf16.msra.mxu2 %v3144_v23  ;;  %1339 = vmatpush.bf16.msrb.mxu3 %v3000_v28  ;;  %v3557_v22 = vld [vmem:[%s6951_s1 + $0x4f0] sm:$0xf0]  ;;  %v246_v23 = vunpack.c.h.b16 %v29_v5  ;;  %v3572_v24 = vor.u32 %v4519_v11, %v3571_v10  ;;  %v4389_v26 = vld [vmem:[%s6951_s1 + $0x104] sm:$0xf]  ;;  %v3304_v28 = vor.u32 %v4449_v14, %v3301_v15  ;;  %v5199_v34 = vpack.c.b16 %v245_v18, %v245_v18 }
  0x34   :  { %v3061_v27 = vld [vmem:[%s6951_s1 + $0x110] sm:$0xf0]  ;;  %v4545_v30 = vld [vmem:[%s6951_s1 + $0x5e4] sm:$0xf]  ;;  %v3560_v33 = vor.u32 %v4513_v21, %v3557_v22 }
  0x35   :  { %1301 = vmatpush.bf16.msrb.mxu0 %v3492_v37  ;;  %1314 = vmatpush.bf16.msrb.mxu1 %v3620_v40  ;;  %v3685_v31 = vld [vmem:[%s6951_s1 + $0x5f0] sm:$0xf0]  ;;  %v4445_v32 = vld [vmem:[%s6951_s1 + $0x2c4] sm:$0xf]  ;;  %v3064_v38 = vor.u32 %v4389_v26, %v3061_v27  ;;  %v5210_v39 = vpack.c.b16 %v246_v23, %v246_v23 }
  0x36   :  { %3713 = vmatmul.msk.bf16.vlgmr.msrb.gmra.mxu2 %vm1241_vm0, %v5111_v48  ;;  %v3285_v35 = vld [vmem:[%s6951_s1 + $0x2d0] sm:$0xf0]  ;;  %v4509_v40 = vld [vmem:[%s6951_s1 + $0x4c4] sm:$0xf]  ;;  %v3688_v42 = vor.u32 %v4545_v30, %v3685_v31 }
  0x37   :  { %1352 = vmatpush.bf16.msra.mxu2 %v3128_v36  ;;  %1340 = vmatpush.bf16.msrb.mxu3 %v2984_v41  ;;  %v4477_v36 = vld [vmem:[%s6951_s1 + $0x3c4] sm:$0xf]  ;;  %v3413_v37 = vld [vmem:[%s6951_s1 + $0x3d0] sm:$0xf0]  ;;  %v3288_v43 = vor.u32 %v4445_v32, %v3285_v35 }
  0x38   :  { %v3541_v41 = vld [vmem:[%s6951_s1 + $0x4d0] sm:$0xf0]  ;;  %v3416_v44 = vor.u32 %v4477_v36, %v3413_v37  ;;  %v4541_v45 = vld [vmem:[%s6951_s1 + $0x5c4] sm:$0xf] }
  0x39   :  { %1302 = vmatpush.bf16.msrb.mxu0 %v3476_v50  ;;  %1315 = vmatpush.bf16.msrb.mxu1 %v3604_v54  ;;  %v3669_v46 = vld [vmem:[%s6951_s1 + $0x5d0] sm:$0xf0]  ;;  %v4441_v47 = vld [vmem:[%s6951_s1 + $0x2a4] sm:$0xf] }
  0x3a   :  { %v3269_v50 = vld [vmem:[%s6951_s1 + $0x2b0] sm:$0xf0]  ;;  %v4473_v51 = vld [vmem:[%s6951_s1 + $0x3a4] sm:$0xf]  ;;  %v3672_v56 = vor.u32 %v4541_v45, %v3669_v46 }
  0x3b   :  { %1353 = vmatpush.bf16.msra.mxu2 %v3112_v49  ;;  %1341 = vmatpush.bf16.msrb.mxu3 %v2968_v55  ;;  %v3544_v49 = vor.u32 %v4509_v40, %v3541_v41  ;;  %v3397_v52 = vld [vmem:[%s6951_s1 + $0x3b0] sm:$0xf0]  ;;  %v4505_v54 = vld [vmem:[%s6951_s1 + $0x4a4] sm:$0xf]  ;;  %v3272_v58 = vor.u32 %v4441_v47, %v3269_v50 }
  0x3c   :  { %v3525_v55 = vld [vmem:[%s6951_s1 + $0x4b0] sm:$0xf0]  ;;  %v3400_v59 = vor.u32 %v4473_v51, %v3397_v52  ;;  %v4537_v61 = vld [vmem:[%s6951_s1 + $0x5a4] sm:$0xf] }
  0x3d   :  { %1303 = vmatpush.bf16.msrb.mxu0 %v3460_v2  ;;  %1316 = vmatpush.bf16.msrb.mxu1 %v3588_v6  ;;  %v3653_v62 = vld [vmem:[%s6951_s1 + $0x5b0] sm:$0xf0]  ;;  %v4437_v63 = vld [vmem:[%s6951_s1 + $0x284] sm:$0xf]  ;;  %v3528_v0 = vor.u32 %v4505_v54, %v3525_v55 }
  0x3e   :  { %v4469_v2 = vld [vmem:[%s6951_s1 + $0x384] sm:$0xf]  ;;  %v3381_v3 = vld [vmem:[%s6951_s1 + $0x390] sm:$0xf0]  ;;  %v3656_v6 = vor.u32 %v4537_v61, %v3653_v62  ;;  %v3051_v61 = vld [vmem:[%s6951_s1 + $0xe8] sm:$0xf] }
  0x3f   :  { %1354 = vmatpush.bf16.msra.mxu2 %v3096_v1  ;;  %1342 = vmatpush.bf16.msrb.mxu3 %v2952_v7  ;;  %v3253_v1 = vld [vmem:[%s6951_s1 + $0x290] sm:$0xf0]  ;;  %v4501_v4 = vld [vmem:[%s6951_s1 + $0x484] sm:$0xf]  ;;  %v3384_v8 = vor.u32 %v4469_v2, %v3381_v3  ;;  %v4388_v62 = vld [vmem:[%s6951_s1 + $0xf4] sm:$0xf0] }
  0x40   :  { %v3509_v5 = vld [vmem:[%s6951_s1 + $0x490] sm:$0xf0]  ;;  %v3256_v7 = vor.u32 %v4437_v63, %v3253_v1  ;;  %v4533_v10 = vld [vmem:[%s6951_s1 + $0x584] sm:$0xf]  ;;  %v3307_v2 = vld [vmem:[%s6951_s1 + $0x2e8] sm:$0xf] }
  0x41   :  { %1304 = vmatpush.bf16.msrb.mxu0 %v3444_v20  ;;  %1317 = vmatpush.bf16.msrb.mxu1 %v3572_v24  ;;  %v3637_v11 = vld [vmem:[%s6951_s1 + $0x590] sm:$0xf0]  ;;  %v4433_v12 = vld [vmem:[%s6951_s1 + $0x264] sm:$0xf]  ;;  %v3512_v13 = vor.u32 %v4501_v4, %v3509_v5  ;;  %v4452_v3 = vld [vmem:[%s6951_s1 + $0x2f4] sm:$0xf0] }
  0x42   :  { %v3237_v14 = vld [vmem:[%s6951_s1 + $0x270] sm:$0xf0]  ;;  %v4465_v15 = vld [vmem:[%s6951_s1 + $0x364] sm:$0xf] }
  0x43   :  { %1355 = vmatpush.bf16.msra.mxu2 %v3080_v19  ;;  %1343 = vmatpush.bf16.msrb.mxu3 %v2936_v25  ;;  %v3365_v16 = vld [vmem:[%s6951_s1 + $0x370] sm:$0xf0]  ;;  %v4497_v17 = vld [vmem:[%s6951_s1 + $0x464] sm:$0xf]  ;;  %v3640_v19 = vor.u32 %v4533_v10, %v3637_v11  ;;  %v3240_v20 = vor.u32 %v4433_v12, %v3237_v14  ;;  %v3052_v10 = vor.u32 %v4388_v62, %v3051_v61  ;;  %v3435_v11 = vld [vmem:[%s6951_s1 + $0x3e8] sm:$0xf] }
  0x44   :  { %1305 = vmatmul.bf16.vlgmr.msrb.gmra.mxu0 %v5199_v34  ;;  %1318 = vmatmul.bf16.vlgmr.msrb.gmra.mxu1 %v5210_v39  ;;  %v3493_v18 = vld [vmem:[%s6951_s1 + $0x470] sm:$0xf0]  ;;  %v3368_v21 = vor.u32 %v4465_v15, %v3365_v16  ;;  %v4529_v22 = vld [vmem:[%s6951_s1 + $0x564] sm:$0xf]  ;;  %v4484_v12 = vld [vmem:[%s6951_s1 + $0x3f4] sm:$0xf0]  ;;  %v3308_v16 = vor.u32 %v4452_v3, %v3307_v2 }
  0x45   :  { %1362 = vmatpush.bf16.msra.mxu0 %v3304_v28  ;;  %1375 = vmatpush.bf16.msra.mxu1 %v3432_v29  ;;  %v3621_v23 = vld [vmem:[%s6951_s1 + $0x570] sm:$0xf0]  ;;  %v4429_v24 = vld [vmem:[%s6951_s1 + $0x244] sm:$0xf]  ;;  %v3496_v25 = vor.u32 %v4497_v17, %v3493_v18  ;;  %v3179_v14 = vld [vmem:[%s6951_s1 + $0x1e8] sm:$0xf] }
  0x46   :  { %1344 = vmatmul.bf16.vlgmr.msrb.gmra.mxu3 %v5002_v57  ;;  %v3221_v26 = vld [vmem:[%s6951_s1 + $0x250] sm:$0xf0]  ;;  %v4461_v27 = vld [vmem:[%s6951_s1 + $0x344] sm:$0xf]  ;;  %v3624_v31 = vor.u32 %v4529_v22, %v3621_v23  ;;  %v4420_v15 = vld [vmem:[%s6951_s1 + $0x1f4] sm:$0xf0] }
  0x47   :  { %1388 = vmatpush.bf16.msra.mxu3 %v3560_v33  ;;  %1356 = vmatpush.bf16.msra.mxu2 %v3064_v38  ;;  %v3349_v28 = vld [vmem:[%s6951_s1 + $0x350] sm:$0xf0]  ;;  %v4493_v29 = vld [vmem:[%s6951_s1 + $0x444] sm:$0xf]  ;;  %v3224_v32 = vor.u32 %v4429_v24, %v3221_v26  ;;  %v3035_v18 = vld [vmem:[%s6951_s1 + $0xc8] sm:$0xf]  ;;  %v3180_v23 = vor.u32 %v4420_v15, %v3179_v14 }
  0x48   :  { %v3477_v30 = vld [vmem:[%s6951_s1 + $0x450] sm:$0xf0]  ;;  %v3352_v33 = vor.u32 %v4461_v27, %v3349_v28  ;;  %v4525_v35 = vld [vmem:[%s6951_s1 + $0x544] sm:$0xf]  ;;  %v4448_v22 = vld [vmem:[%s6951_s1 + $0x2d4] sm:$0xf0] }
  0x49   :  { %1363 = vmatpush.bf16.msra.mxu0 %v3288_v43  ;;  %1376 = vmatpush.bf16.msra.mxu1 %v3416_v44  ;;  %v3605_v36 = vld [vmem:[%s6951_s1 + $0x550] sm:$0xf0]  ;;  %v4425_v37 = vld [vmem:[%s6951_s1 + $0x224] sm:$0xf]  ;;  %v3480_v38 = vor.u32 %v4493_v29, %v3477_v30  ;;  %v3419_v24 = vld [vmem:[%s6951_s1 + $0x3c8] sm:$0xf] }
  0x4a   :  { %1357 = vmatmul.bf16.vlgmr.msra.gmra.mxu2 %v5032_v9  ;;  %v3205_v40 = vld [vmem:[%s6951_s1 + $0x230] sm:$0xf0]  ;;  %v4457_v41 = vld [vmem:[%s6951_s1 + $0x324] sm:$0xf]  ;;  %v3608_v45 = vor.u32 %v4525_v35, %v3605_v36  ;;  %v3163_v27 = vld [vmem:[%s6951_s1 + $0x1c8] sm:$0xf] }
  0x4b   :  { %1401 = vmatpush.bf16.msrb.mxu2 %v3688_v42  ;;  %1389 = vmatpush.bf16.msra.mxu3 %v3544_v49  ;;  %v3333_v42 = vld [vmem:[%s6951_s1 + $0x330] sm:$0xf0]  ;;  %v4489_v43 = vld [vmem:[%s6951_s1 + $0x424] sm:$0xf]  ;;  %v3208_v49 = vor.u32 %v4425_v37, %v3205_v40  ;;  %v4416_v28 = vld [vmem:[%s6951_s1 + $0x1d4] sm:$0xf0] }
  0x4c   :  { %v3461_v44 = vld [vmem:[%s6951_s1 + $0x430] sm:$0xf0]  ;;  %v4521_v46 = vld [vmem:[%s6951_s1 + $0x524] sm:$0xf]  ;;  %v3336_v50 = vor.u32 %v4457_v41, %v3333_v42  ;;  %v3019_v30 = vld [vmem:[%s6951_s1 + $0xa8] sm:$0xf]  ;;  %v3164_v36 = vor.u32 %v4416_v28, %v3163_v27 }
  0x4d   :  { %1364 = vmatpush.bf16.msra.mxu0 %v3272_v58  ;;  %1377 = vmatpush.bf16.msra.mxu1 %v3400_v59  ;;  %v3589_v47 = vld [vmem:[%s6951_s1 + $0x530] sm:$0xf0]  ;;  %v4421_v51 = vld [vmem:[%s6951_s1 + $0x204] sm:$0xf]  ;;  %v3464_v55 = vor.u32 %v4489_v43, %v3461_v44  ;;  %v4444_v35 = vld [vmem:[%s6951_s1 + $0x2b4] sm:$0xf0] }
  0x4e   :  { %v3189_v52 = vld [vmem:[%s6951_s1 + $0x210] sm:$0xf0]  ;;  %v4453_v54 = vld [vmem:[%s6951_s1 + $0x304] sm:$0xf]  ;;  %v3403_v37 = vld [vmem:[%s6951_s1 + $0x3a8] sm:$0xf] }
  0x4f   :  { %1402 = vmatpush.bf16.msrb.mxu2 %v3672_v56  ;;  %1390 = vmatpush.bf16.msra.mxu3 %v3528_v0  ;;  %v3317_v56 = vld [vmem:[%s6951_s1 + $0x310] sm:$0xf0]  ;;  %v4485_v58 = vld [vmem:[%s6951_s1 + $0x404] sm:$0xf]  ;;  %v3592_v0 = vor.u32 %v4521_v46, %v3589_v47  ;;  %v3192_v4 = vor.u32 %v4421_v51, %v3189_v52  ;;  %v3147_v41 = vld [vmem:[%s6951_s1 + $0x1a8] sm:$0xf] }
  0x50   :  { %v3445_v59 = vld [vmem:[%s6951_s1 + $0x410] sm:$0xf0]  ;;  %v4549_v63 = vld [vmem:[%s6951_s1 + $0x604] sm:$0xf]  ;;  %v3320_v5 = vor.u32 %v4453_v54, %v3317_v56  ;;  %v4412_v42 = vld [vmem:[%s6951_s1 + $0x1b4] sm:$0xf0] }
  0x51   :  { %1365 = vmatpush.bf16.msra.mxu0 %v3256_v7  ;;  %1378 = vmatpush.bf16.msra.mxu1 %v3384_v8  ;;  %v3701_v1 = vld [vmem:[%s6951_s1 + $0x610] sm:$0xf0]  ;;  %v3448_v8 = vor.u32 %v4485_v58, %v3445_v59  ;;  %v3003_v44 = vld [vmem:[%s6951_s1 + $0x88] sm:$0xf]  ;;  %v4472_v52 = vld [vmem:[%s6951_s1 + $0x394] sm:$0xf0] }
  0x52   :  { %v3573_v7 = vld [vmem:[%s6951_s1 + $0x510] sm:$0xf0]  ;;  %v3259_v47 = vld [vmem:[%s6951_s1 + $0x288] sm:$0xf]  ;;  %v4408_v56 = vld [vmem:[%s6951_s1 + $0x194] sm:$0xf0] }
  0x53   :  { %1403 = vmatpush.bf16.msrb.mxu2 %v3656_v6  ;;  %1391 = vmatpush.bf16.msra.mxu3 %v3512_v13  ;;  %v4517_v6 = vld [vmem:[%s6951_s1 + $0x504] sm:$0xf]  ;;  %v3704_v13 = vor.u32 %v4549_v63, %v3701_v1  ;;  %v3387_v51 = vld [vmem:[%s6951_s1 + $0x388] sm:$0xf]  ;;  %v4372_v61 = vld [vmem:[%s6951_s1 + $0x74] sm:$0xf0] }
  0x54   :  { %v3576_v17 = vor.u32 %v4517_v6, %v3573_v7  ;;  %v2987_v59 = vld [vmem:[%s6951_s1 + $0x68] sm:$0xf]  ;;  %v3388_v62 = vor.u32 %v4472_v52, %v3387_v51  ;;  %v4468_v3 = vld [vmem:[%s6951_s1 + $0x374] sm:$0xf0]  ;;  %v4386_v51 = vld [vmem:[%s6951_s1 + $0xec] sm:$0xf] }
  0x55   :  { %1366 = vmatpush.bf16.msra.mxu0 %v3240_v20  ;;  %1379 = vmatpush.bf16.msra.mxu1 %v3368_v21  ;;  %v3436_v20 = vor.u32 %v4484_v12, %v3435_v11  ;;  %v3291_v21 = vld [vmem:[%s6951_s1 + $0x2c8] sm:$0xf]  ;;  %v4404_v6 = vld [vmem:[%s6951_s1 + $0x174] sm:$0xf0]  ;;  %v3053_v52 = vld [vmem:[%s6951_s1 + $0xf8] sm:$0xf0] }
  0x56   :  { %v3292_v29 = vor.u32 %v4448_v22, %v3291_v21  ;;  %v3243_v63 = vld [vmem:[%s6951_s1 + $0x268] sm:$0xf]  ;;  %v4364_v22 = vld [vmem:[%s6951_s1 + $0x34] sm:$0xf0] }
  0x57   :  { %1404 = vmatpush.bf16.msrb.mxu2 %v3640_v19  ;;  %1392 = vmatpush.bf16.msra.mxu3 %v3496_v25  ;;  %v4384_v19 = vld [vmem:[%s6951_s1 + $0xd4] sm:$0xf0]  ;;  %v3371_v2 = vld [vmem:[%s6951_s1 + $0x368] sm:$0xf] }
  0x58   :  { %v4480_v25 = vld [vmem:[%s6951_s1 + $0x3d4] sm:$0xf0]  ;;  %v3036_v26 = vor.u32 %v4384_v19, %v3035_v18  ;;  %v3372_v11 = vor.u32 %v4468_v3, %v3371_v2  ;;  %v3227_v12 = vld [vmem:[%s6951_s1 + $0x248] sm:$0xf]  ;;  %v3056_v3 = vor.u32 %v4386_v51, %v3053_v52 }
  0x59   :  { %1367 = vmatpush.bf16.msra.mxu0 %v3224_v32  ;;  %1380 = vmatpush.bf16.msra.mxu1 %v3352_v33  ;;  %v3420_v32 = vor.u32 %v4480_v25, %v3419_v24  ;;  %v3275_v33 = vld [vmem:[%s6951_s1 + $0x2a8] sm:$0xf]  ;;  %v4400_v19 = vld [vmem:[%s6951_s1 + $0x154] sm:$0xf0] }
  0x5a   :  { %v3276_v43 = vor.u32 %v4444_v35, %v3275_v33  ;;  %v3355_v15 = vld [vmem:[%s6951_s1 + $0x348] sm:$0xf]  ;;  %v4428_v25 = vld [vmem:[%s6951_s1 + $0x234] sm:$0xf0] }
  0x5b   :  { %1405 = vmatpush.bf16.msrb.mxu2 %v3624_v31  ;;  %1393 = vmatpush.bf16.msra.mxu3 %v3480_v38  ;;  %v4380_v31 = vld [vmem:[%s6951_s1 + $0xb4] sm:$0xf0]  ;;  %v3099_v18 = vld [vmem:[%s6951_s1 + $0x148] sm:$0xf] }
  0x5c   :  { %v4476_v38 = vld [vmem:[%s6951_s1 + $0x3b4] sm:$0xf0]  ;;  %v3020_v40 = vor.u32 %v4380_v31, %v3019_v30  ;;  %v2955_v21 = vld [vmem:[%s6951_s1 + $0x28] sm:$0xf] }
  0x5d   :  { %1368 = vmatpush.bf16.msra.mxu0 %v3208_v49  ;;  %1381 = vmatpush.bf16.msra.mxu1 %v3336_v50  ;;  %v3404_v46 = vor.u32 %v4476_v38, %v3403_v37  ;;  %v4440_v49 = vld [vmem:[%s6951_s1 + $0x294] sm:$0xf0]  ;;  %v3148_v50 = vor.u32 %v4412_v42, %v3147_v41  ;;  %v3211_v24 = vld [vmem:[%s6951_s1 + $0x228] sm:$0xf] }
  0x5e   :  { %v3260_v58 = vor.u32 %v4440_v49, %v3259_v47  ;;  %v3339_v27 = vld [vmem:[%s6951_s1 + $0x328] sm:$0xf]  ;;  %v4460_v28 = vld [vmem:[%s6951_s1 + $0x334] sm:$0xf0]  ;;  %v3212_v33 = vor.u32 %v4428_v25, %v3211_v24 }
  0x5f   :  { %1406 = vmatpush.bf16.msrb.mxu2 %v3608_v45  ;;  %1394 = vmatpush.bf16.msra.mxu3 %v3464_v55  ;;  %v4376_v45 = vld [vmem:[%s6951_s1 + $0x94] sm:$0xf0]  ;;  %v3131_v55 = vld [vmem:[%s6951_s1 + $0x188] sm:$0xf]  ;;  %v3340_v38 = vor.u32 %v4460_v28, %v3339_v27  ;;  %v3149_v27 = vld [vmem:[%s6951_s1 + $0x1b8] sm:$0xf0] }
  0x60   :  { %v3004_v54 = vor.u32 %v4376_v45, %v3003_v44  ;;  %v3132_v1 = vor.u32 %v4408_v56, %v3131_v55  ;;  %v3083_v30 = vld [vmem:[%s6951_s1 + $0x128] sm:$0xf]  ;;  %v4396_v31 = vld [vmem:[%s6951_s1 + $0x134] sm:$0xf0] }
  0x61   :  { %1369 = vmatpush.bf16.msra.mxu0 %v3192_v4  ;;  %1382 = vmatpush.bf16.msra.mxu1 %v3320_v5  ;;  %v2988_v4 = vor.u32 %v4372_v61, %v2987_v59  ;;  %v3115_v5 = vld [vmem:[%s6951_s1 + $0x168] sm:$0xf]  ;;  %v4360_v35 = vld [vmem:[%s6951_s1 + $0x14] sm:$0xf0]  ;;  %v3084_v44 = vor.u32 %v4396_v31, %v3083_v30  ;;  %v4374_v30 = vld [vmem:[%s6951_s1 + $0x8c] sm:$0xf] }
  0x62   :  { %v3116_v14 = vor.u32 %v4404_v6, %v3115_v5  ;;  %v4516_v37 = vld [vmem:[%s6951_s1 + $0x4f4] sm:$0xf0]  ;;  %v3195_v41 = vld [vmem:[%s6951_s1 + $0x208] sm:$0xf]  ;;  %v4382_v5 = vld [vmem:[%s6951_s1 + $0xcc] sm:$0xf] }
  0x63   :  { %1407 = vmatpush.bf16.msrb.mxu2 %v3592_v0  ;;  %1395 = vmatpush.bf16.msra.mxu3 %v3448_v8  ;;  %v4436_v0 = vld [vmem:[%s6951_s1 + $0x274] sm:$0xf0]  ;;  %v2971_v8 = vld [vmem:[%s6951_s1 + $0x48] sm:$0xf]  ;;  %v3037_v6 = vld [vmem:[%s6951_s1 + $0xd8] sm:$0xf0] }
  0x64   :  { %1370 = vmatmul.bf16.vlgmr.msra.gmra.mxu0 %v4991_v53  ;;  %1383 = vmatmul.bf16.vlgmr.msra.gmra.mxu1 %v5004_v60  ;;  %v3244_v7 = vor.u32 %v4436_v0, %v3243_v63  ;;  %v4424_v42 = vld [vmem:[%s6951_s1 + $0x214] sm:$0xf0]  ;;  %v3691_v56 = vld [vmem:[%s6951_s1 + $0x5e8] sm:$0xf]  ;;  %v4418_v0 = vld [vmem:[%s6951_s1 + $0x1ec] sm:$0xf] }
  0x65   :  { %1427 = vmatpush.bf16.msrb.mxu1 %v3052_v10  ;;  %1453 = vmatpush.bf16.msrb.mxu0 %v3308_v16  ;;  %v4368_v10 = vld [vmem:[%s6951_s1 + $0x54] sm:$0xf0]  ;;  %v3196_v55 = vor.u32 %v4424_v42, %v3195_v41  ;;  %v3547_v59 = vld [vmem:[%s6951_s1 + $0x4c8] sm:$0xf]  ;;  %v3005_v31 = vld [vmem:[%s6951_s1 + $0x98] sm:$0xf0] }
  0x66   :  { %1396 = vmatmul.bf16.vlgmr.msra.gmra.mxu3 %v5199_v34  ;;  %v4464_v16 = vld [vmem:[%s6951_s1 + $0x354] sm:$0xf0]  ;;  %v3515_v24 = vld [vmem:[%s6951_s1 + $0x488] sm:$0xf]  ;;  %v3133_v41 = vld [vmem:[%s6951_s1 + $0x198] sm:$0xf0]  ;;  %v3008_v42 = vor.u32 %v4374_v30, %v3005_v31 }
  0x67   :  { %1421 = vmatpush.bf16.msrb.mxu3 %v3704_v13  ;;  %1408 = vmatpush.bf16.msrb.mxu2 %v3576_v17  ;;  %v4432_v13 = vld [vmem:[%s6951_s1 + $0x254] sm:$0xf0]  ;;  %v2972_v17 = vor.u32 %v4368_v10, %v2971_v8  ;;  %v3675_v10 = vld [vmem:[%s6951_s1 + $0x5c8] sm:$0xf]  ;;  %v3437_v30 = vld [vmem:[%s6951_s1 + $0x3f8] sm:$0xf0] }
  0x68   :  { %v4456_v45 = vld [vmem:[%s6951_s1 + $0x314] sm:$0xf0]  ;;  %v3483_v51 = vld [vmem:[%s6951_s1 + $0x448] sm:$0xf] }
  0x69   :  { %1428 = vmatpush.bf16.msrb.mxu1 %v3036_v26  ;;  %1454 = vmatpush.bf16.msrb.mxu0 %v3292_v29  ;;  %v3100_v26 = vor.u32 %v4400_v19, %v3099_v18  ;;  %v2956_v29 = vor.u32 %v4364_v22, %v2955_v21  ;;  %v4552_v47 = vld [vmem:[%s6951_s1 + $0x614] sm:$0xf0]  ;;  %v4378_v18 = vld [vmem:[%s6951_s1 + $0xac] sm:$0xf]  ;;  %v3021_v19 = vld [vmem:[%s6951_s1 + $0xb8] sm:$0xf0] }
  0x6a   :  { %1409 = vmatmul.bf16.vlgmr.msrb.gmra.mxu2 %v5210_v39  ;;  %v3659_v22 = vld [vmem:[%s6951_s1 + $0x5a8] sm:$0xf]  ;;  %v4504_v25 = vld [vmem:[%s6951_s1 + $0x494] sm:$0xf0]  ;;  %v3024_v28 = vor.u32 %v4378_v18, %v3021_v19  ;;  %v3085_v18 = vld [vmem:[%s6951_s1 + $0x138] sm:$0xf0] }
  0x6b   :  { %1466 = vmatpush.bf16.msra.mxu2 %v3436_v20  ;;  %1440 = vmatpush.bf16.msra.mxu3 %v3180_v23  ;;  %v3228_v20 = vor.u32 %v4432_v13, %v3227_v12  ;;  %v3356_v23 = vor.u32 %v4464_v16, %v3355_v15  ;;  %v3531_v12 = vld [vmem:[%s6951_s1 + $0x4a8] sm:$0xf]  ;;  %v4508_v13 = vld [vmem:[%s6951_s1 + $0x4b4] sm:$0xf0]  ;;  %v3165_v15 = vld [vmem:[%s6951_s1 + $0x1d8] sm:$0xf0]  ;;  %v3040_v16 = vor.u32 %v4382_v5, %v3037_v6 }
  0x6c   :  { %v4496_v52 = vld [vmem:[%s6951_s1 + $0x454] sm:$0xf0]  ;;  %v3101_v5 = vld [vmem:[%s6951_s1 + $0x158] sm:$0xf0] }
  0x6d   :  { %1429 = vmatpush.bf16.msrb.mxu1 %v3020_v40  ;;  %1455 = vmatpush.bf16.msrb.mxu0 %v3276_v43  ;;  %v3067_v40 = vld [vmem:[%s6951_s1 + $0x108] sm:$0xf] }
  0x6e   :  { %v3323_v43 = vld [vmem:[%s6951_s1 + $0x308] sm:$0xf] }
  0x6f   :  { %1467 = vmatpush.bf16.msra.mxu2 %v3420_v32  ;;  %1441 = vmatpush.bf16.msra.mxu3 %v3164_v36  ;;  %v2939_v32 = vld [vmem:[%s6951_s1 + $0x8] sm:$0xf]  ;;  %v3324_v61 = vor.u32 %v4456_v45, %v3323_v43  ;;  %v2989_v45 = vld [vmem:[%s6951_s1 + $0x78] sm:$0xf0] }
  0x70   :  { %v3563_v36 = vld [vmem:[%s6951_s1 + $0x4e8] sm:$0xf]  ;;  %v2940_v49 = vor.u32 %v4360_v35, %v2939_v32  ;;  %v3516_v32 = vor.u32 %v4504_v25, %v3515_v24  ;;  %v4358_v24 = vld [vmem:[%s6951_s1 + $0xc] sm:$0xf]  ;;  %v2941_v25 = vld [vmem:[%s6951_s1 + $0x18] sm:$0xf0] }
  0x71   :  { %1430 = vmatpush.bf16.msrb.mxu1 %v3004_v54  ;;  %1456 = vmatpush.bf16.msrb.mxu0 %v3260_v58  ;;  %v3564_v54 = vor.u32 %v4516_v37, %v3563_v36  ;;  %v4548_v58 = vld [vmem:[%s6951_s1 + $0x5f4] sm:$0xf0]  ;;  %v3643_v35 = vld [vmem:[%s6951_s1 + $0x588] sm:$0xf] }
  0x72   :  { %v4536_v36 = vld [vmem:[%s6951_s1 + $0x594] sm:$0xf0]  ;;  %v3499_v37 = vld [vmem:[%s6951_s1 + $0x468] sm:$0xf] }
  0x73   :  { %1468 = vmatpush.bf16.msra.mxu2 %v3404_v46  ;;  %1442 = vmatpush.bf16.msra.mxu3 %v3148_v50  ;;  %v3707_v46 = vld [vmem:[%s6951_s1 + $0x608] sm:$0xf]  ;;  %v4392_v50 = vld [vmem:[%s6951_s1 + $0x114] sm:$0xf0]  ;;  %v3644_v43 = vor.u32 %v4536_v36, %v3643_v35  ;;  %v4446_v35 = vld [vmem:[%s6951_s1 + $0x2cc] sm:$0xf]  ;;  %v2944_v36 = vor.u32 %v4358_v24, %v2941_v25 }
  0x74   :  { %v3708_v63 = vor.u32 %v4552_v47, %v3707_v46  ;;  %v3068_v2 = vor.u32 %v4392_v50, %v3067_v40  ;;  %v4406_v40 = vld [vmem:[%s6951_s1 + $0x18c] sm:$0xf]  ;;  %v4532_v50 = vld [vmem:[%s6951_s1 + $0x574] sm:$0xf0]  ;;  %v3373_v25 = vld [vmem:[%s6951_s1 + $0x378] sm:$0xf0] }
  0x75   :  { %1431 = vmatpush.bf16.msrb.mxu1 %v2988_v4  ;;  %1457 = vmatpush.bf16.msrb.mxu0 %v3244_v7  ;;  %v3692_v4 = vor.u32 %v4548_v58, %v3691_v56  ;;  %v3136_v47 = vor.u32 %v4406_v40, %v3133_v41  ;;  %v3069_v40 = vld [vmem:[%s6951_s1 + $0x118] sm:$0xf0] }
  0x76   :  { %3714 = vmatmul.msk.bf16.vlgmr.msrb.gmra.mxu3 %vm1241_vm0, %v5111_v48 }
  0x77   :  { %1469 = vmatpush.bf16.msra.mxu2 %v3388_v62  ;;  %1443 = vmatpush.bf16.msra.mxu3 %v3132_v1  ;;  %v4512_v62 = vld [vmem:[%s6951_s1 + $0x4d4] sm:$0xf0]  ;;  %v3181_v1 = vld [vmem:[%s6951_s1 + $0x1f8] sm:$0xf0] }
  0x78   :  { %v3548_v7 = vor.u32 %v4512_v62, %v3547_v59  ;;  %v3184_v8 = vor.u32 %v4418_v0, %v3181_v1  ;;  %v4366_v59 = vld [vmem:[%s6951_s1 + $0x4c] sm:$0xf]  ;;  %v3484_v62 = vor.u32 %v4496_v52, %v3483_v51  ;;  %v3611_v0 = vld [vmem:[%s6951_s1 + $0x548] sm:$0xf]  ;;  %v4528_v1 = vld [vmem:[%s6951_s1 + $0x554] sm:$0xf0] }
  0x79   :  { %1432 = vmatpush.bf16.msrb.mxu1 %v2972_v17  ;;  %1458 = vmatpush.bf16.msrb.mxu0 %v3228_v20  ;;  %v3532_v20 = vor.u32 %v4508_v13, %v3531_v12  ;;  %v3595_v13 = vld [vmem:[%s6951_s1 + $0x528] sm:$0xf]  ;;  %v4510_v51 = vld [vmem:[%s6951_s1 + $0x4cc] sm:$0xf]  ;;  %v3549_v52 = vld [vmem:[%s6951_s1 + $0x4d8] sm:$0xf0] }
  0x7b   :  { %1470 = vmatpush.bf16.msra.mxu2 %v3372_v11  ;;  %1444 = vmatpush.bf16.msra.mxu3 %v3116_v14  ;;  %v4544_v11 = vld [vmem:[%s6951_s1 + $0x5d4] sm:$0xf0]  ;;  %v4414_v14 = vld [vmem:[%s6951_s1 + $0x1cc] sm:$0xf] }
  0x7c   :  { %v3676_v17 = vor.u32 %v4544_v11, %v3675_v10  ;;  %v3168_v21 = vor.u32 %v4414_v14, %v3165_v15  ;;  %v2957_v10 = vld [vmem:[%s6951_s1 + $0x38] sm:$0xf0]  ;;  %v4524_v14 = vld [vmem:[%s6951_s1 + $0x534] sm:$0xf0]  ;;  %v3451_v15 = vld [vmem:[%s6951_s1 + $0x408] sm:$0xf] }
  0x7d   :  { %1433 = vmatpush.bf16.msrb.mxu1 %v2956_v29  ;;  %1459 = vmatpush.bf16.msrb.mxu0 %v3212_v33 }
  0x7f   :  { %1471 = vmatpush.bf16.msra.mxu2 %v3356_v23  ;;  %1445 = vmatpush.bf16.msra.mxu3 %v3100_v26  ;;  %v4540_v23 = vld [vmem:[%s6951_s1 + $0x5b4] sm:$0xf0]  ;;  %v4410_v26 = vld [vmem:[%s6951_s1 + $0x1ac] sm:$0xf] }
  0x80   :  { %v3660_v29 = vor.u32 %v4540_v23, %v3659_v22  ;;  %v3152_v33 = vor.u32 %v4410_v26, %v3149_v27  ;;  %v3596_v22 = vor.u32 %v4524_v14, %v3595_v13  ;;  %v3579_v23 = vld [vmem:[%s6951_s1 + $0x508] sm:$0xf]  ;;  %v4502_v14 = vld [vmem:[%s6951_s1 + $0x48c] sm:$0xf] }
  0x81   :  { %1434 = vmatpush.bf16.msrb.mxu1 %v2940_v49  ;;  %1460 = vmatpush.bf16.msrb.mxu0 %v3196_v55  ;;  %v3627_v49 = vld [vmem:[%s6951_s1 + $0x568] sm:$0xf]  ;;  %v3117_v55 = vld [vmem:[%s6951_s1 + $0x178] sm:$0xf0] }
  0x82   :  { %v3628_v58 = vor.u32 %v4532_v50, %v3627_v49  ;;  %v3421_v50 = vld [vmem:[%s6951_s1 + $0x3d8] sm:$0xf0] }
  0x83   :  { %1472 = vmatpush.bf16.msra.mxu2 %v3340_v38  ;;  %1446 = vmatpush.bf16.msra.mxu3 %v3084_v44  ;;  %v4500_v38 = vld [vmem:[%s6951_s1 + $0x474] sm:$0xf0]  ;;  %v4370_v44 = vld [vmem:[%s6951_s1 + $0x6c] sm:$0xf] }
  0x84   :  { %1461 = vmatmul.bf16.vlgmr.msrb.gmra.mxu0 %v4991_v53  ;;  %1435 = vmatmul.bf16.vlgmr.msrb.gmra.mxu1 %v5002_v57  ;;  %v3500_v46 = vor.u32 %v4500_v38, %v3499_v37  ;;  %v2992_v56 = vor.u32 %v4370_v44, %v2989_v45  ;;  %v3293_v37 = vld [vmem:[%s6951_s1 + $0x2d8] sm:$0xf0]  ;;  %v4390_v38 = vld [vmem:[%s6951_s1 + $0x10c] sm:$0xf] }
  0x85   :  { %1479 = vmatpush.bf16.msra.mxu1 %v3564_v54  ;;  %1512 = vmatpush.bf16.msra.mxu0 %v3708_v63  ;;  %v4402_v54 = vld [vmem:[%s6951_s1 + $0x16c] sm:$0xf]  ;;  %v3072_v49 = vor.u32 %v4390_v38, %v3069_v40 }
  0x86   :  { %v3120_v63 = vor.u32 %v4402_v54, %v3117_v55  ;;  %v4442_v55 = vld [vmem:[%s6951_s1 + $0x2ac] sm:$0xf] }
  0x87   :  { %1473 = vmatpush.bf16.msra.mxu2 %v3324_v61  ;;  %1447 = vmatpush.bf16.msra.mxu3 %v3068_v2  ;;  %v2973_v61 = vld [vmem:[%s6951_s1 + $0x58] sm:$0xf0]  ;;  %v3467_v2 = vld [vmem:[%s6951_s1 + $0x428] sm:$0xf]  ;;  %v4462_v38 = vld [vmem:[%s6951_s1 + $0x34c] sm:$0xf] }
  0x88   :  { %v2976_v6 = vor.u32 %v4366_v59, %v2973_v61  ;;  %v3677_v59 = vld [vmem:[%s6951_s1 + $0x5d8] sm:$0xf0] }
  0x89   :  { %1480 = vmatpush.bf16.msra.mxu1 %v3548_v7  ;;  %1531 = vmatpush.bf16.msrb.mxu0 %v3184_v8  ;;  %v3612_v7 = vor.u32 %v4528_v1, %v3611_v0  ;;  %v4362_v8 = vld [vmem:[%s6951_s1 + $0x2c] sm:$0xf]  ;;  %v3405_v1 = vld [vmem:[%s6951_s1 + $0x3b8] sm:$0xf0] }
  0x8a   :  { %1448 = vmatmul.bf16.vlgmr.msra.gmra.mxu3 %v5032_v9  ;;  %1474 = vmatmul.bf16.vlgmr.msra.gmra.mxu2 %v5004_v60  ;;  %v2960_v19 = vor.u32 %v4362_v8, %v2957_v10  ;;  %v3661_v8 = vld [vmem:[%s6951_s1 + $0x5b8] sm:$0xf0] }
  0x8b   :  { %1518 = vmatpush.bf16.msrb.mxu2 %v3056_v3  ;;  %1492 = vmatpush.bf16.msrb.mxu3 %v3692_v4  ;;  %v4492_v3 = vld [vmem:[%s6951_s1 + $0x434] sm:$0xf0]  ;;  %v4398_v4 = vld [vmem:[%s6951_s1 + $0x14c] sm:$0xf] }
  0x8c   :  { %v3468_v11 = vor.u32 %v4492_v3, %v3467_v2  ;;  %v3104_v12 = vor.u32 %v4398_v4, %v3101_v5  ;;  %v4506_v2 = vld [vmem:[%s6951_s1 + $0x4ac] sm:$0xf]  ;;  %v3533_v3 = vld [vmem:[%s6951_s1 + $0x4b8] sm:$0xf0] }
  0x8d   :  { %1481 = vmatpush.bf16.msra.mxu1 %v3532_v20  ;;  %1532 = vmatpush.bf16.msrb.mxu0 %v3168_v21  ;;  %v4450_v20 = vld [vmem:[%s6951_s1 + $0x2ec] sm:$0xf]  ;;  %v3309_v21 = vld [vmem:[%s6951_s1 + $0x2f8] sm:$0xf0] }
  0x8e   :  { %v3312_v31 = vor.u32 %v4450_v20, %v3309_v21  ;;  %v4438_v5 = vld [vmem:[%s6951_s1 + $0x28c] sm:$0xf] }
  0x8f   :  { %1519 = vmatpush.bf16.msrb.mxu2 %v3040_v16  ;;  %1493 = vmatpush.bf16.msrb.mxu3 %v3676_v17  ;;  %v4488_v16 = vld [vmem:[%s6951_s1 + $0x414] sm:$0xf0]  ;;  %v4394_v17 = vld [vmem:[%s6951_s1 + $0x12c] sm:$0xf] }
  0x90   :  { %v3452_v26 = vor.u32 %v4488_v16, %v3451_v15  ;;  %v3088_v27 = vor.u32 %v4394_v17, %v3085_v18  ;;  %v3517_v15 = vld [vmem:[%s6951_s1 + $0x498] sm:$0xf0]  ;;  %v4434_v17 = vld [vmem:[%s6951_s1 + $0x26c] sm:$0xf] }
  0x91   :  { %1482 = vmatpush.bf16.msra.mxu1 %v3516_v32  ;;  %1533 = vmatpush.bf16.msrb.mxu0 %v3152_v33  ;;  %v4514_v32 = vld [vmem:[%s6951_s1 + $0x4ec] sm:$0xf]  ;;  %v3565_v33 = vld [vmem:[%s6951_s1 + $0x4f8] sm:$0xf0] }
  0x92   :  { %v3568_v45 = vor.u32 %v4514_v32, %v3565_v33  ;;  %v3245_v18 = vld [vmem:[%s6951_s1 + $0x278] sm:$0xf0]  ;;  %v4534_v20 = vld [vmem:[%s6951_s1 + $0x58c] sm:$0xf] }
  0x93   :  { %1520 = vmatpush.bf16.msrb.mxu2 %v3024_v28  ;;  %1494 = vmatpush.bf16.msrb.mxu3 %v3660_v29  ;;  %v4520_v28 = vld [vmem:[%s6951_s1 + $0x514] sm:$0xf0]  ;;  %v4482_v29 = vld [vmem:[%s6951_s1 + $0x3ec] sm:$0xf]  ;;  %v3248_v24 = vor.u32 %v4434_v17, %v3245_v18  ;;  %v3629_v33 = vld [vmem:[%s6951_s1 + $0x578] sm:$0xf0] }
  0x94   :  { %3715 = vmatmul.msk.bf16.vlgmr.msra.gmra.mxu0 %vm1241_vm0, %v5111_v48  ;;  %v3580_v41 = vor.u32 %v4520_v28, %v3579_v23  ;;  %v3440_v44 = vor.u32 %v4482_v29, %v3437_v30  ;;  %v4466_v23 = vld [vmem:[%s6951_s1 + $0x36c] sm:$0xf]  ;;  %v3831_v17 = vld [vmem:[%s6954_s3 + $0xe0] sm:$0xf]  ;;  %v4583_v18 = vld [vmem:[%s6954_s3 + $0xec] sm:$0xf0] }
  0x95   :  { %1483 = vmatpush.bf16.msra.mxu1 %v3500_v46  ;;  %1534 = vmatpush.bf16.msrb.mxu0 %v3136_v47  ;;  %v4478_v46 = vld [vmem:[%s6951_s1 + $0x3cc] sm:$0xf]  ;;  %v3296_v47 = vor.u32 %v4446_v35, %v3293_v37 }
  0x96   :  { %v3424_v61 = vor.u32 %v4478_v46, %v3421_v50  ;;  %v4430_v30 = vld [vmem:[%s6951_s1 + $0x24c] sm:$0xf] }
  0x97   :  { %1521 = vmatpush.bf16.msrb.mxu2 %v3008_v42  ;;  %1495 = vmatpush.bf16.msrb.mxu3 %v3644_v43  ;;  %v4546_v42 = vld [vmem:[%s6951_s1 + $0x5ec] sm:$0xf]  ;;  %v3693_v43 = vld [vmem:[%s6951_s1 + $0x5f8] sm:$0xf0] }
  0x98   :  { %v3696_v54 = vor.u32 %v4546_v42, %v3693_v43  ;;  %v4530_v32 = vld [vmem:[%s6951_s1 + $0x56c] sm:$0xf]  ;;  %v3357_v42 = vld [vmem:[%s6951_s1 + $0x358] sm:$0xf0] }
  0x99   :  { %1484 = vmatpush.bf16.msra.mxu1 %v3484_v62  ;;  %1535 = vmatpush.bf16.msrb.mxu0 %v3120_v63  ;;  %v3552_v62 = vor.u32 %v4510_v51, %v3549_v52  ;;  %v4474_v63 = vld [vmem:[%s6951_s1 + $0x3ac] sm:$0xf]  ;;  %v3613_v51 = vld [vmem:[%s6951_s1 + $0x558] sm:$0xf0]  ;;  %v3360_v52 = vor.u32 %v4462_v38, %v3357_v42  ;;  %v3799_v42 = vld [vmem:[%s6954_s3 + $0xa0] sm:$0xf] }
  0x9a   :  { %v3408_v10 = vor.u32 %v4474_v63, %v3405_v1  ;;  %v4494_v43 = vld [vmem:[%s6951_s1 + $0x44c] sm:$0xf] }
  0x9b   :  { %1522 = vmatpush.bf16.msrb.mxu2 %v2992_v56  ;;  %1496 = vmatpush.bf16.msrb.mxu3 %v3628_v58  ;;  %v3277_v56 = vld [vmem:[%s6951_s1 + $0x2b8] sm:$0xf0]  ;;  %v4542_v58 = vld [vmem:[%s6951_s1 + $0x5cc] sm:$0xf] }
  0x9c   :  { %v3280_v0 = vor.u32 %v4442_v55, %v3277_v56  ;;  %v3680_v4 = vor.u32 %v4542_v58, %v3677_v59  ;;  %v4426_v46 = vld [vmem:[%s6951_s1 + $0x22c] sm:$0xf]  ;;  %v3341_v58 = vld [vmem:[%s6951_s1 + $0x338] sm:$0xf0] }
  0x9d   :  { %1485 = vmatpush.bf16.msra.mxu1 %v3468_v11  ;;  %1536 = vmatpush.bf16.msrb.mxu0 %v3104_v12  ;;  %v3536_v11 = vor.u32 %v4506_v2, %v3533_v3  ;;  %v4470_v12 = vld [vmem:[%s6951_s1 + $0x38c] sm:$0xf]  ;;  %v3597_v3 = vld [vmem:[%s6951_s1 + $0x538] sm:$0xf0] }
  0x9e   :  { %v4526_v50 = vld [vmem:[%s6951_s1 + $0x54c] sm:$0xf] }
  0x9f   :  { %1523 = vmatpush.bf16.msrb.mxu2 %v2976_v6  ;;  %1497 = vmatpush.bf16.msrb.mxu3 %v3612_v7  ;;  %v3261_v6 = vld [vmem:[%s6951_s1 + $0x298] sm:$0xf0]  ;;  %v4538_v7 = vld [vmem:[%s6951_s1 + $0x5ac] sm:$0xf] }
  0xa0   :  { %v3264_v13 = vor.u32 %v4438_v5, %v3261_v6  ;;  %v3664_v16 = vor.u32 %v4538_v7, %v3661_v8  ;;  %v4458_v55 = vld [vmem:[%s6951_s1 + $0x32c] sm:$0xf]  ;;  %v3709_v5 = vld [vmem:[%s6951_s1 + $0x618] sm:$0xf0]  ;;  %v5975_v6 = vld [vmem:[%s6953_s2] sm:$0xf] }
  0xa1   :  { %1486 = vmatpush.bf16.msra.mxu1 %v3452_v26  ;;  %1537 = vmatpush.bf16.msrb.mxu0 %v3088_v27  ;;  %v4498_v26 = vld [vmem:[%s6951_s1 + $0x46c] sm:$0xf]  ;;  %v3501_v27 = vld [vmem:[%s6951_s1 + $0x478] sm:$0xf0]  ;;  %v3344_v8 = vor.u32 %v4458_v55, %v3341_v58  ;;  %v3767_v55 = vld [vmem:[%s6954_s3 + $0x60] sm:$0xf] }
  0xa2   :  { %v3504_v37 = vor.u32 %v4498_v26, %v3501_v27  ;;  %v4490_v59 = vld [vmem:[%s6951_s1 + $0x42c] sm:$0xf]  ;;  %v3832_v27 = vor.u32 %v4583_v18, %v3831_v17  ;;  %v4555_v17 = vld [vmem:[%s6954_s3 + $0xc] sm:$0xf0] }
  0xa3   :  { %1524 = vmatpush.bf16.msrb.mxu2 %v2960_v19  ;;  %1498 = vmatpush.bf16.msrb.mxu3 %v3596_v22  ;;  %v3520_v22 = vor.u32 %v4502_v14, %v3517_v15  ;;  %v4422_v63 = vld [vmem:[%s6951_s1 + $0x20c] sm:$0xf]  ;;  %v3453_v14 = vld [vmem:[%s6951_s1 + $0x418] sm:$0xf0] }
  0xa4   :  { %1487 = vmatmul.bf16.vlgmr.msra.gmra.mxu1 %v5199_v34  ;;  %v4522_v1 = vld [vmem:[%s6951_s1 + $0x52c] sm:$0xf] }
  0xa5   :  { %1544 = vmatpush.bf16.msrb.mxu1 %v3312_v31  ;;  %1538 = vmatpush.bf16.msrb.mxu0 %v3072_v49  ;;  %v5880_v19 = vpop.f32.mrf.mxu0  ;;  %v5900_v29 = vpop.f32.mrf.mxu1  ;;  %v3229_v31 = vld [vmem:[%s6951_s1 + $0x258] sm:$0xf0] }
  0xa6   :  { %v3232_v40 = vor.u32 %v4430_v30, %v3229_v31  ;;  %v3815_v30 = vld [vmem:[%s6954_s3 + $0xc0] sm:$0xf]  ;;  %v4579_v31 = vld [vmem:[%s6954_s3 + $0xcc] sm:$0xf0] }
  0xa7   :  { %1525 = vmatpush.bf16.msrb.mxu2 %v2944_v36  ;;  %1499 = vmatpush.bf16.msrb.mxu3 %v3580_v41  ;;  %v3376_v36 = vor.u32 %v4466_v23, %v3373_v25  ;;  %v4615_v23 = vld [vmem:[%s6954_s3 + $0x1ec] sm:$0xf0] }
  0xa8   :  { %1539 = vmatmul.bf16.vlgmr.msrb.gmra.mxu0 %v5032_v9  ;;  %v3645_v9 = vld [vmem:[%s6951_s1 + $0x598] sm:$0xf0]  ;;  %v5914_v35 = vpop.f32.mrf.mxu2 }
  0xa9   :  { %1545 = vmatpush.bf16.msrb.mxu1 %v3296_v47  ;;  %1583 = vmatpush.bf16.msra.mxu0 %v3696_v54  ;;  %v3648_v28 = vor.u32 %v4534_v20, %v3645_v9  ;;  %v5919_v41 = vpop.f32.mrf.mxu3  ;;  %v3213_v47 = vld [vmem:[%s6951_s1 + $0x238] sm:$0xf0]  ;;  %v4518_v20 = vld [vmem:[%s6951_s1 + $0x50c] sm:$0xf] }
  0xaa   :  { %1500 = vmatmul.bf16.vlgmr.msrb.gmra.mxu3 %v5210_v39  ;;  %1526 = vmatmul.bf16.vlgmr.msrb.gmra.mxu2 %v5002_v57  ;;  %v3389_v57 = vld [vmem:[%s6951_s1 + $0x398] sm:$0xf0]  ;;  %v3216_v56 = vor.u32 %v4426_v46, %v3213_v47  ;;  %v4571_v47 = vld [vmem:[%s6954_s3 + $0x8c] sm:$0xf0] }
  0xab   :  { %1557 = vmatpush.bf16.msra.mxu3 %v3440_v44  ;;  %1570 = vmatpush.bf16.msra.mxu2 %v3568_v45  ;;  %v3392_v21 = vor.u32 %v4470_v12, %v3389_v57  ;;  %v3485_v44 = vld [vmem:[%s6951_s1 + $0x458] sm:$0xf0]  ;;  %v3632_v45 = vor.u32 %v4530_v32, %v3629_v33  ;;  %v4486_v57 = vld [vmem:[%s6951_s1 + $0x40c] sm:$0xf]  ;;  %v3943_v33 = vld [vmem:[%s6954_s3 + $0x1c0] sm:$0xf] }
  0xac   :  { %v3488_v54 = vor.u32 %v4494_v43, %v3485_v44  ;;  %v3456_v26 = vor.u32 %v4486_v57, %v3453_v14  ;;  %v4575_v43 = vld [vmem:[%s6954_s3 + $0xac] sm:$0xf0] }
  0xad   :  { %1546 = vmatpush.bf16.msrb.mxu1 %v3280_v0  ;;  %1584 = vmatpush.bf16.msra.mxu0 %v3680_v4  ;;  %v1256_v49 = vpop.f32.mrf.mxu0  ;;  %v3197_v0 = vld [vmem:[%s6951_s1 + $0x218] sm:$0xf0]  ;;  %v1269_v2 = vpop.f32.mrf.mxu1  ;;  %v4550_v4 = vld [vmem:[%s6951_s1 + $0x60c] sm:$0xf]  ;;  %v3800_v46 = vor.u32 %v4575_v43, %v3799_v42  ;;  %v4591_v14 = vld [vmem:[%s6954_s3 + $0x12c] sm:$0xf0] }
  0xae   :  { %v3200_v12 = vor.u32 %v4422_v63, %v3197_v0  ;;  %v3712_v9 = vor.u32 %v4550_v4, %v3709_v5  ;;  %v3751_v0 = vld [vmem:[%s6954_s3 + $0x40] sm:$0xf]  ;;  %v4577_v42 = vld [vmem:[%s6954_s3 + $0xc4] sm:$0xf]  ;;  %v3817_v43 = vld [vmem:[%s6954_s3 + $0xd0] sm:$0xf0] }
  0xaf   :  { %1558 = vmatpush.bf16.msra.mxu3 %v3424_v61  ;;  %1571 = vmatpush.bf16.msra.mxu2 %v3552_v62  ;;  %v3469_v61 = vld [vmem:[%s6951_s1 + $0x438] sm:$0xf0]  ;;  %v3616_v62 = vor.u32 %v4526_v50, %v3613_v51  ;;  %v3879_v4 = vld [vmem:[%s6954_s3 + $0x140] sm:$0xf] }
  0xb0   :  { %v1282_v7 = vpop.f32.mrf.mxu2 }
  0xb1   :  { %1547 = vmatpush.bf16.msrb.mxu1 %v3264_v13  ;;  %1585 = vmatpush.bf16.msra.mxu0 %v3664_v16  ;;  %v3325_v13 = vld [vmem:[%s6951_s1 + $0x318] sm:$0xf0]  ;;  %v1295_v15 = vpop.f32.mrf.mxu3  ;;  %v3600_v16 = vor.u32 %v4522_v1, %v3597_v3  ;;  %v4563_v1 = vld [vmem:[%s6954_s3 + $0x4c] sm:$0xf0] }
  0xb3   :  { %1559 = vmatpush.bf16.msra.mxu3 %v3408_v10  ;;  %1572 = vmatpush.bf16.msra.mxu2 %v3536_v11  ;;  %v3472_v10 = vor.u32 %v4490_v59, %v3469_v61  ;;  %v4454_v11 = vld [vmem:[%s6951_s1 + $0x30c] sm:$0xf]  ;;  %v3895_v59 = vld [vmem:[%s6954_s3 + $0x160] sm:$0xf] }
  0xb4   :  { %v3328_v25 = vor.u32 %v4454_v11, %v3325_v13  ;;  %v4559_v13 = vld [vmem:[%s6954_s3 + $0x2c] sm:$0xf0] }
  0xb5   :  { %1548 = vmatpush.bf16.msrb.mxu1 %v3248_v24  ;;  %1586 = vmatpush.bf16.msra.mxu0 %v3648_v28  ;;  %v229_v24 = vperm.slane %v5975_v6, 0 }
  0xb7   :  { %1560 = vmatpush.bf16.msra.mxu3 %v3392_v21  ;;  %1573 = vmatpush.bf16.msra.mxu2 %v3520_v22  ;;  %v3581_v21 = vld [vmem:[%s6951_s1 + $0x518] sm:$0xf0]  ;;  %v3959_v22 = vld [vmem:[%s6954_s3 + $0x1e0] sm:$0xf] }
  0xb8   :  { %v3584_v28 = vor.u32 %v4518_v20, %v3581_v21  ;;  %v3960_v32 = vor.u32 %v4615_v23, %v3959_v22  ;;  %v4581_v20 = vld [vmem:[%s6954_s3 + $0xe4] sm:$0xf]  ;;  %v4087_v21 = vld [vmem:[%s6954_s3 + $0x2e0] sm:$0xf]  ;;  %v4647_v22 = vld [vmem:[%s6954_s3 + $0x2ec] sm:$0xf0] }
  0xb9   :  { %1549 = vmatpush.bf16.msrb.mxu1 %v3232_v40  ;;  %1587 = vmatpush.bf16.msra.mxu0 %v3632_v45  ;;  %v6022_v38 = vpop.f32.mrf.mxu2  ;;  %v3816_v40 = vor.u32 %v4579_v31, %v3815_v30  ;;  %v3961_v30 = vld [vmem:[%s6954_s3 + $0x1f0] sm:$0xf0] }
  0xbb   :  { %1561 = vmatpush.bf16.msra.mxu3 %v3376_v36  ;;  %1574 = vmatpush.bf16.msra.mxu2 %v3504_v37  ;;  %v4611_v36 = vld [vmem:[%s6954_s3 + $0x1cc] sm:$0xf0]  ;;  %v1255_v37 = vadd.f32 %v5880_v19, %v229_v24  ;;  %v3833_v24 = vld [vmem:[%s6954_s3 + $0xf0] sm:$0xf0] }
  0xbc   :  { %v3944_v44 = vor.u32 %v4611_v36, %v3943_v33  ;;  %v4607_v19 = vld [vmem:[%s6954_s3 + $0x1ac] sm:$0xf0]  ;;  %v3836_v36 = vor.u32 %v4581_v20, %v3833_v24 }
  0xbd   :  { %1550 = vmatpush.bf16.msrb.mxu1 %v3216_v56  ;;  %1588 = vmatpush.bf16.msra.mxu0 %v3616_v62  ;;  %v1268_v45 = vadd.f32 %v5900_v29, %v1255_v37  ;;  %v3911_v29 = vld [vmem:[%s6954_s3 + $0x180] sm:$0xf]  ;;  %v4567_v56 = vld [vmem:[%s6954_s3 + $0x6c] sm:$0xf0] }
  0xbe   :  { %v3768_v62 = vor.u32 %v4567_v56, %v3767_v55  ;;  %v4039_v55 = vld [vmem:[%s6954_s3 + $0x280] sm:$0xf]  ;;  %v4635_v56 = vld [vmem:[%s6954_s3 + $0x28c] sm:$0xf0] }
  0xbf   :  { %1562 = vmatpush.bf16.msra.mxu3 %v3360_v52  ;;  %1575 = vmatpush.bf16.msra.mxu2 %v3488_v54 }
  0xc1   :  { %1551 = vmatpush.bf16.msrb.mxu1 %v3200_v12  ;;  %1589 = vmatpush.bf16.msra.mxu0 %v3600_v16  ;;  %v1306_v50 = vpop.f32.mrf.mxu0  ;;  %v1319_v51 = vpop.f32.mrf.mxu1  ;;  %v3735_v12 = vld [vmem:[%s6954_s3 + $0x20] sm:$0xf] }
  0xc2   :  { %v1334_v52 = vpop.f32.mrf.mxu2  ;;  %v3736_v15 = vor.u32 %v4559_v13, %v3735_v12  ;;  %v3719_v16 = vld [vmem:[%s6954_s3] sm:$0xf]  ;;  %v4597_v13 = vld [vmem:[%s6954_s3 + $0x164] sm:$0xf] }
  0xc3   :  { %1563 = vmatpush.bf16.msra.mxu3 %v3344_v8  ;;  %1576 = vmatpush.bf16.msra.mxu2 %v3472_v10  ;;  %v3752_v8 = vor.u32 %v4563_v1, %v3751_v0  ;;  %v3720_v31 = vor.u32 %v4555_v17, %v3719_v16  ;;  %v3929_v52 = vld [vmem:[%s6954_s3 + $0x1b0] sm:$0xf0]  ;;  %v4561_v17 = vld [vmem:[%s6954_s3 + $0x44] sm:$0xf] }
  0xc4   :  { %1552 = vmatmul.bf16.vlgmr.msrb.gmra.mxu1 %v4991_v53  ;;  %v3927_v53 = vld [vmem:[%s6954_s3 + $0x1a0] sm:$0xf] }
  0xc5   :  { %1603 = vmatpush.bf16.msra.mxu1 %v3712_v9  ;;  %1590 = vmatpush.bf16.msra.mxu0 %v3584_v28  ;;  %v3928_v49 = vor.u32 %v4607_v19, %v3927_v53  ;;  %v4613_v28 = vld [vmem:[%s6954_s3 + $0x1e4] sm:$0xf] }
  0xc6   :  { %v4609_v19 = vld [vmem:[%s6954_s3 + $0x1c4] sm:$0xf] }
  0xc7   :  { %1564 = vmatpush.bf16.msra.mxu3 %v3328_v25  ;;  %1577 = vmatpush.bf16.msra.mxu2 %v3456_v26  ;;  %v3847_v25 = vld [vmem:[%s6954_s3 + $0x100] sm:$0xf]  ;;  %v4587_v26 = vld [vmem:[%s6954_s3 + $0x10c] sm:$0xf0] }
  0xc8   :  { %1591 = vmatmul.bf16.vlgmr.msra.gmra.mxu0 %v5210_v39  ;;  %v1281_v39 = vadd.f32 %v5914_v35, %v1268_v45  ;;  %v4599_v35 = vld [vmem:[%s6954_s3 + $0x16c] sm:$0xf0]  ;;  %v3848_v37 = vor.u32 %v4587_v26, %v3847_v25  ;;  %v3945_v45 = vld [vmem:[%s6954_s3 + $0x1d0] sm:$0xf0]  ;;  %v3991_v26 = vld [vmem:[%s6954_s3 + $0x220] sm:$0xf] }
  0xc9   :  { %2408 = vmatpush.bf16.msrb.mxu1 %v3960_v32  ;;  %v3896_v2 = vor.u32 %v4599_v35, %v3895_v59  ;;  %v6072_v3 = vpop.f32.mrf.mxu3  ;;  %v1308_v5 = vpop.f32.mrf.mxu0  ;;  %v3785_v59 = vld [vmem:[%s6954_s3 + $0x90] sm:$0xf0] }
  0xca   :  { %1565 = vmatmul.bf16.vlgmr.msra.gmra.mxu3 %v5004_v60  ;;  %1578 = vmatmul.bf16.vlgmr.msra.gmra.mxu2 %v5199_v34  ;;  %v3783_v60 = vld [vmem:[%s6954_s3 + $0x80] sm:$0xf]  ;;  %v4603_v34 = vld [vmem:[%s6954_s3 + $0x18c] sm:$0xf0]  ;;  %v1294_v61 = vadd.f32 %v5919_v41, %v1281_v39  ;;  %v1321_v7 = vpop.f32.mrf.mxu1 }
  0xcb   :  { %2395 = vmatpush.bf16.msrb.mxu3 %v3832_v27  ;;  %v3784_v54 = vor.u32 %v4571_v47, %v3783_v60  ;;  %v3912_v58 = vor.u32 %v4603_v34, %v3911_v29  ;;  %v4595_v41 = vld [vmem:[%s6954_s3 + $0x14c] sm:$0xf0]  ;;  %v4088_v27 = vor.u32 %v4647_v22, %v4087_v21  ;;  %v3820_v60 = vor.u32 %v4577_v42, %v3817_v43  ;;  %v4055_v47 = vld [vmem:[%s6954_s3 + $0x2a0] sm:$0xf]  ;;  %v3801_v29 = vld [vmem:[%s6954_s3 + $0xb0] sm:$0xf0] }
  0xcc   :  { %v1307_v63 = vadd.f32 %v1306_v50, %v1294_v61  ;;  %v3880_v57 = vor.u32 %v4595_v41, %v3879_v4  ;;  %v4573_v50 = vld [vmem:[%s6954_s3 + $0xa4] sm:$0xf]  ;;  %v3948_v34 = vor.u32 %v4609_v19, %v3945_v45  ;;  %v4040_v61 = vor.u32 %v4635_v56, %v4039_v55  ;;  %v4631_v4 = vld [vmem:[%s6954_s3 + $0x26c] sm:$0xf0]  ;;  %v3721_v43 = vld [vmem:[%s6954_s3 + $0x10] sm:$0xf0] }
  0xcd   :  { %2409 = vmatpush.bf16.msrb.mxu1 %v3944_v44  ;;  %v6082_v10 = vpop.f32.mrf.mxu2  ;;  %2421 = vmatpush.bf16.msrb.mxu2 %v4088_v27  ;;  %v3964_v44 = vor.u32 %v4613_v28, %v3961_v30  ;;  %v230_v41 = vperm.slane %v5975_v6, 1  ;;  %v4565_v7 = vld [vmem:[%s6954_s3 + $0x64] sm:$0xf]  ;;  %v4623_v27 = vld [vmem:[%s6954_s3 + $0x22c] sm:$0xf0] }
  0xce   :  { %v1320_v11 = vadd.f32 %v1319_v51, %v1307_v63  ;;  %v4605_v51 = vld [vmem:[%s6954_s3 + $0x1a4] sm:$0xf]  ;;  %v3913_v63 = vld [vmem:[%s6954_s3 + $0x190] sm:$0xf0]  ;;  %v3839_v19 = vld [vmem:[%s6954_s3 + $0xe8] sm:$0xf] }
  0xcf   :  { %2396 = vmatpush.bf16.msrb.mxu3 %v3816_v40  ;;  %v4643_v40 = vld [vmem:[%s6954_s3 + $0x2cc] sm:$0xf0]  ;;  %v3932_v35 = vor.u32 %v4605_v51, %v3929_v52  ;;  %v1346_v16 = vadd.f32 %v6072_v3, %v230_v41  ;;  %v4593_v22 = vld [vmem:[%s6954_s3 + $0x144] sm:$0xf]  ;;  %v3881_v3 = vld [vmem:[%s6954_s3 + $0x150] sm:$0xf0] }
  0xd0   :  { %v1333_v18 = vadd.f32 %v6022_v38, %v1320_v11  ;;  %v4071_v38 = vld [vmem:[%s6954_s3 + $0x2c0] sm:$0xf]  ;;  %v4557_v30 = vld [vmem:[%s6954_s3 + $0x24] sm:$0xf] }
  0xd1   :  { %2410 = vmatpush.bf16.msrb.mxu1 %v3928_v49  ;;  %v1347_v23 = vpop.f32.mrf.mxu3  ;;  %v4072_v53 = vor.u32 %v4643_v40, %v4071_v38  ;;  %v4639_v49 = vld [vmem:[%s6954_s3 + $0x2ac] sm:$0xf0]  ;;  %v1359_v28 = vadd.f32 %v6082_v10, %v1346_v16  ;;  %v3865_v10 = vld [vmem:[%s6954_s3 + $0x130] sm:$0xf0]  ;;  %v4553_v40 = vld [vmem:[%s6954_s3 + $0x4] sm:$0xf] }
  0xd2   :  { %v1609_v33 = vmax.f32 %v1333_v18, 0.0  ;;  %v4056_v39 = vor.u32 %v4639_v49, %v4055_v47  ;;  %v3753_v18 = vld [vmem:[%s6954_s3 + $0x50] sm:$0xf0]  ;;  %v4645_v47 = vld [vmem:[%s6954_s3 + $0x2e4] sm:$0xf] }
  0xd3   :  { %2397 = vmatpush.bf16.msrb.mxu3 %v3800_v46  ;;  %2422 = vmatpush.bf16.msrb.mxu2 %v4072_v53  ;;  %v3756_v25 = vor.u32 %v4561_v17, %v3753_v18  ;;  %v4619_v53 = vld [vmem:[%s6954_s3 + $0x20c] sm:$0xf0]  ;;  %v4089_v49 = vld [vmem:[%s6954_s3 + $0x2f0] sm:$0xf0]  ;;  %v3967_v16 = vld [vmem:[%s6954_s3 + $0x1e8] sm:$0xf] }
  0xd4   :  { %3716 = vmatmul.msk.bf16.vlgmr.msra.gmra.mxu1 %vm1241_vm0, %v5111_v48  ;;  %v3863_v48 = vld [vmem:[%s6954_s3 + $0x120] sm:$0xf]  ;;  %v6145_v46 = vpack.c.bf16 %v1609_v33, %v1609_v33  ;;  %v4092_v51 = vor.u32 %v4645_v47, %v4089_v49  ;;  %v4616_v17 = vld [vmem:[%s6954_s3 + $0x1f4] sm:$0xf0] }
  0xd5   :  { %2411 = vmatpush.bf16.msrb.mxu1 %v3912_v58  ;;  %v3864_v9 = vor.u32 %v4591_v14, %v3863_v48  ;;  %v1360_v32 = vpop.f32.mrf.mxu2  ;;  %v4569_v58 = vld [vmem:[%s6954_s3 + $0x84] sm:$0xf]  ;;  %v4007_v14 = vld [vmem:[%s6954_s3 + $0x240] sm:$0xf] }
  0xd6   :  { %v3788_v1 = vor.u32 %v4569_v58, %v3785_v59  ;;  %v3884_v32 = vor.u32 %v4593_v22, %v3881_v3  ;;  %v3823_v59 = vld [vmem:[%s6954_s3 + $0xc8] sm:$0xf]  ;;  %v4572_v22 = vld [vmem:[%s6954_s3 + $0x94] sm:$0xf0]  ;;  %v4633_v3 = vld [vmem:[%s6954_s3 + $0x284] sm:$0xf] }
  0xd7   :  { %2398 = vmatpush.bf16.msrb.mxu3 %v3784_v54  ;;  %2423 = vmatpush.bf16.msrb.mxu2 %v4056_v39  ;;  %v3804_v54 = vor.u32 %v4573_v50, %v3801_v29  ;;  %v4584_v29 = vld [vmem:[%s6954_s3 + $0xf4] sm:$0xf0]  ;;  %v3849_v39 = vld [vmem:[%s6954_s3 + $0x110] sm:$0xf0] }
  0xd8   :  { %v3840_v58 = vor.u32 %v4584_v29, %v3839_v19  ;;  %v4667_v19 = vld [vmem:[%s6954_s3 + $0x38c] sm:$0xf0]  ;;  %v3759_v29 = vld [vmem:[%s6954_s3 + $0x48] sm:$0xf] }
  0xd9   :  { %2412 = vmatpush.bf16.msrb.mxu1 %v3896_v2  ;;  %v4023_v2 = vld [vmem:[%s6954_s3 + $0x260] sm:$0xf] }
  0xda   :  { %v4024_v12 = vor.u32 %v4631_v4, %v4023_v2  ;;  %v4679_v2 = vld [vmem:[%s6954_s3 + $0x3ec] sm:$0xf0] }
  0xdb   :  { %2399 = vmatpush.bf16.msrb.mxu3 %v3768_v62  ;;  %v4601_v62 = vld [vmem:[%s6954_s3 + $0x184] sm:$0xf]  ;;  %2424 = vmatpush.bf16.msrb.mxu2 %v4040_v61 }
  0xdc   :  { %v3916_v11 = vor.u32 %v4601_v62, %v3913_v63  ;;  %v4641_v61 = vld [vmem:[%s6954_s3 + $0x2c4] sm:$0xf]  ;;  %v4073_v62 = vld [vmem:[%s6954_s3 + $0x2d0] sm:$0xf0]  ;;  %v4580_v63 = vld [vmem:[%s6954_s3 + $0xd4] sm:$0xf0] }
  0xdd   :  { %2413 = vmatpush.bf16.msrb.mxu1 %v3880_v57  ;;  %v3897_v57 = vld [vmem:[%s6954_s3 + $0x170] sm:$0xf0] }
  0xde   :  { %v3900_v20 = vor.u32 %v4597_v13, %v3897_v57  ;;  %v4576_v13 = vld [vmem:[%s6954_s3 + $0xb4] sm:$0xf0] }
  0xdf   :  { %2400 = vmatpush.bf16.msrb.mxu3 %v3752_v8  ;;  %v3769_v8 = vld [vmem:[%s6954_s3 + $0x70] sm:$0xf0]  ;;  %2425 = vmatpush.bf16.msrb.mxu2 %v4024_v12 }
  0xe0   :  { %v3772_v48 = vor.u32 %v4565_v7, %v3769_v8  ;;  %v3807_v7 = vld [vmem:[%s6954_s3 + $0xa8] sm:$0xf]  ;;  %v4637_v8 = vld [vmem:[%s6954_s3 + $0x2a4] sm:$0xf] }
  0xe1   :  { %2414 = vmatpush.bf16.msrb.mxu1 %v3864_v9  ;;  %v1371_v0 = vpop.f32.mrf.mxu0  ;;  %v1384_v5 = vpop.f32.mrf.mxu1 }
  0xe2   :  { %v1372_v38 = vadd.f32 %v1371_v0, %v1359_v28  ;;  %v4076_v0 = vor.u32 %v4641_v61, %v4073_v62  ;;  %v3951_v28 = vld [vmem:[%s6954_s3 + $0x1c8] sm:$0xf] }
  0xe3   :  { %2401 = vmatpush.bf16.msrb.mxu3 %v3736_v15  ;;  %v4627_v15 = vld [vmem:[%s6954_s3 + $0x24c] sm:$0xf0]  ;;  %v3743_v62 = vld [vmem:[%s6954_s3 + $0x28] sm:$0xf] }
  0xe4   :  { %v4008_v9 = vor.u32 %v4627_v15, %v4007_v14  ;;  %v1385_v52 = vadd.f32 %v1384_v5, %v1372_v38  ;;  %v3824_v5 = vor.u32 %v4580_v63, %v3823_v59  ;;  %v4675_v14 = vld [vmem:[%s6954_s3 + $0x3cc] sm:$0xf0]  ;;  %v4604_v59 = vld [vmem:[%s6954_s3 + $0x194] sm:$0xf0]  ;;  %v4621_v63 = vld [vmem:[%s6954_s3 + $0x224] sm:$0xf] }
  0xe5   :  { %2415 = vmatpush.bf16.msrb.mxu1 %v3848_v37  ;;  %v4589_v37 = vld [vmem:[%s6954_s3 + $0x124] sm:$0xf] }
  0xe6   :  { %2426 = vmatpush.bf16.msrb.mxu2 %v4008_v9  ;;  %v3868_v45 = vor.u32 %v4589_v37, %v3865_v10  ;;  %v4629_v37 = vld [vmem:[%s6954_s3 + $0x264] sm:$0xf]  ;;  %v4025_v10 = vld [vmem:[%s6954_s3 + $0x270] sm:$0xf0] }
  0xe7   :  { %2402 = vmatpush.bf16.msrb.mxu3 %v3720_v31  ;;  %v3737_v31 = vld [vmem:[%s6954_s3 + $0x30] sm:$0xf0] }
  0xe8   :  { %v3740_v42 = vor.u32 %v4557_v30, %v3737_v31  ;;  %v4612_v30 = vld [vmem:[%s6954_s3 + $0x1d4] sm:$0xf0] }
  0xe9   :  { %2460 = vmatpush.bf16.msra.mxu1 %v3964_v44  ;;  %v1397_v21 = vpop.f32.mrf.mxu3  ;;  %v1373_v23 = vpop.f32.mrf.mxu0  ;;  %v3975_v44 = vld [vmem:[%s6954_s3 + $0x200] sm:$0xf] }
  0xea   :  { %2403 = vmatmul.bf16.vlgmr.msrb.gmra.mxu3 %v6145_v46  ;;  %v1386_v33 = vpop.f32.mrf.mxu1  ;;  %v1398_v56 = vadd.f32 %v1397_v21, %v1385_v52  ;;  %v3808_v21 = vor.u32 %v4576_v13, %v3807_v7  ;;  %v3968_v23 = vor.u32 %v4616_v17, %v3967_v16  ;;  %v4564_v52 = vld [vmem:[%s6954_s3 + $0x54] sm:$0xf0]  ;;  %v4135_v7 = vld [vmem:[%s6954_s3 + $0x340] sm:$0xf]  ;;  %v4617_v17 = vld [vmem:[%s6954_s3 + $0x204] sm:$0xf] }
  0xeb   :  { %2447 = vmatpush.bf16.msra.mxu3 %v3836_v36  ;;  %v3992_v36 = vor.u32 %v4623_v27, %v3991_v26  ;;  %v4671_v26 = vld [vmem:[%s6954_s3 + $0x3ac] sm:$0xf0]  ;;  %v3760_v61 = vor.u32 %v4564_v52, %v3759_v29  ;;  %v4556_v16 = vld [vmem:[%s6954_s3 + $0x14] sm:$0xf0]  ;;  %v3809_v52 = vld [vmem:[%s6954_s3 + $0xb8] sm:$0xf0] }
  0xed   :  { %2461 = vmatpush.bf16.msra.mxu1 %v3948_v34  ;;  %v1410_v24 = vpop.f32.mrf.mxu2  ;;  %2427 = vmatpush.bf16.msrb.mxu2 %v3992_v36  ;;  %v4585_v34 = vld [vmem:[%s6954_s3 + $0x104] sm:$0xf]  ;;  %v3775_v36 = vld [vmem:[%s6954_s3 + $0x68] sm:$0xf] }
  0xee   :  { %v1411_v41 = vadd.f32 %v1410_v24, %v1398_v56  ;;  %v4041_v24 = vld [vmem:[%s6954_s3 + $0x290] sm:$0xf0]  ;;  %v4663_v56 = vld [vmem:[%s6954_s3 + $0x36c] sm:$0xf0] }
  0xef   :  { %2448 = vmatpush.bf16.msra.mxu3 %v3820_v60  ;;  %v3976_v60 = vor.u32 %v4619_v53, %v3975_v44  ;;  %v4044_v31 = vor.u32 %v4633_v3, %v4041_v24  ;;  %v4028_v44 = vor.u32 %v4629_v37, %v4025_v10  ;;  %v4167_v53 = vld [vmem:[%s6954_s3 + $0x380] sm:$0xf]  ;;  %v4655_v3 = vld [vmem:[%s6954_s3 + $0x32c] sm:$0xf0]  ;;  %v4582_v24 = vld [vmem:[%s6954_s3 + $0xec] sm:$0xf] }
  0xf0   :  { %v4168_v47 = vor.u32 %v4667_v19, %v4167_v53  ;;  %v4677_v53 = vld [vmem:[%s6954_s3 + $0x3e4] sm:$0xf]  ;;  %v4217_v19 = vld [vmem:[%s6954_s3 + $0x3f0] sm:$0xf0] }
  0xf1   :  { %2462 = vmatpush.bf16.msra.mxu1 %v3932_v35  ;;  %v1399_v50 = vpop.f32.mrf.mxu3  ;;  %2428 = vmatpush.bf16.msrb.mxu2 %v3976_v60  ;;  %v3852_v35 = vor.u32 %v4585_v34, %v3849_v39  ;;  %v4608_v60 = vld [vmem:[%s6954_s3 + $0x1b4] sm:$0xf0]  ;;  %v4625_v34 = vld [vmem:[%s6954_s3 + $0x244] sm:$0xf]  ;;  %v4009_v39 = vld [vmem:[%s6954_s3 + $0x250] sm:$0xf0] }
  0xf3   :  { %2449 = vmatpush.bf16.msra.mxu3 %v3804_v54  ;;  %v3724_v54 = vor.u32 %v4553_v40, %v3721_v43  ;;  %v4568_v43 = vld [vmem:[%s6954_s3 + $0x74] sm:$0xf0] }
  0xf4   :  { %v3776_v50 = vor.u32 %v4568_v43, %v3775_v36  ;;  %v4578_v36 = vld [vmem:[%s6954_s3 + $0xcc] sm:$0xf]  ;;  %v3825_v43 = vld [vmem:[%s6954_s3 + $0xd8] sm:$0xf0] }
  0xf5   :  { %2463 = vmatpush.bf16.msra.mxu1 %v3916_v11  ;;  %v1412_v55 = vpop.f32.mrf.mxu2  ;;  %2473 = vmatpush.bf16.msra.mxu2 %v4092_v51  ;;  %v4057_v11 = vld [vmem:[%s6954_s3 + $0x2b0] sm:$0xf0]  ;;  %v3828_v29 = vor.u32 %v4578_v36, %v3825_v43  ;;  %v4657_v43 = vld [vmem:[%s6954_s3 + $0x344] sm:$0xf] }
  0xf6   :  { %v4060_v57 = vor.u32 %v4637_v8, %v4057_v11  ;;  %v4151_v55 = vld [vmem:[%s6954_s3 + $0x360] sm:$0xf]  ;;  %v4659_v8 = vld [vmem:[%s6954_s3 + $0x34c] sm:$0xf0]  ;;  %v3903_v11 = vld [vmem:[%s6954_s3 + $0x168] sm:$0xf] }
  0xf7   :  { %2450 = vmatpush.bf16.msra.mxu3 %v3788_v1  ;;  %v4215_v1 = vld [vmem:[%s6954_s3 + $0x3e0] sm:$0xf]  ;;  %v4136_v13 = vor.u32 %v4659_v8, %v4135_v7  ;;  %v4610_v7 = vld [vmem:[%s6954_s3 + $0x1cc] sm:$0xf]  ;;  %v3953_v8 = vld [vmem:[%s6954_s3 + $0x1d8] sm:$0xf0] }
  0xf8   :  { %v4216_v4 = vor.u32 %v4679_v2, %v4215_v1 }
  0xf9   :  { %2464 = vmatpush.bf16.msra.mxu1 %v3900_v20  ;;  %2474 = vmatpush.bf16.msra.mxu2 %v4076_v0  ;;  %v1423_v12 = vpop.f32.mrf.mxu3  ;;  %v3791_v20 = vld [vmem:[%s6954_s3 + $0x88] sm:$0xf]  ;;  %v3993_v0 = vld [vmem:[%s6954_s3 + $0x230] sm:$0xf0] }
  0xfa   :  { %2434 = vmatpush.bf16.msrb.mxu0 %v4216_v4  ;;  %v1424_v15 = vadd.f32 %v1423_v12, %v1411_v41  ;;  %v3792_v33 = vor.u32 %v4572_v22, %v3791_v20  ;;  %v4560_v41 = vld [vmem:[%s6954_s3 + $0x34] sm:$0xf0]  ;;  %v4119_v22 = vld [vmem:[%s6954_s3 + $0x320] sm:$0xf] }
  0xfb   :  { %2451 = vmatpush.bf16.msra.mxu3 %v3772_v48  ;;  %v4199_v48 = vld [vmem:[%s6954_s3 + $0x3c0] sm:$0xf]  ;;  %v4600_v12 = vld [vmem:[%s6954_s3 + $0x174] sm:$0xf0] }
  0xfc   :  { %v4200_v18 = vor.u32 %v4675_v14, %v4199_v48  ;;  %v1610_v9 = vmax.f32 %v1424_v15, 0.0  ;;  %v3727_v48 = vld [vmem:[%s6954_s3 + $0x8] sm:$0xf]  ;;  %v3744_v15 = vor.u32 %v4560_v41, %v3743_v62  ;;  %v3904_v20 = vor.u32 %v4600_v12, %v3903_v11  ;;  %v4185_v41 = vld [vmem:[%s6954_s3 + $0x3b0] sm:$0xf0] }
  0xfd   :  { %2465 = vmatpush.bf16.msra.mxu1 %v3884_v32  ;;  %2475 = vmatpush.bf16.msra.mxu2 %v4060_v57 }
  0xfe   :  { %2435 = vmatpush.bf16.msrb.mxu0 %v4200_v18  ;;  %v6332_v27 = vpack.c.bf16 %v1610_v9, %v1610_v9  ;;  %v3977_v18 = vld [vmem:[%s6954_s3 + $0x210] sm:$0xf0]  ;;  %v3887_v9 = vld [vmem:[%s6954_s3 + $0x148] sm:$0xf] }
  0xff   :  { %2452 = vmatpush.bf16.msra.mxu3 %v3756_v25  ;;  %v4183_v25 = vld [vmem:[%s6954_s3 + $0x3a0] sm:$0xf] }
 0x100   :  { %v4184_v32 = vor.u32 %v4671_v26, %v4183_v25  ;;  %2416 = vmatmul.bf16.vlgmr.msrb.gmra.mxu1 %v6332_v27  ;;  %v3841_v25 = vld [vmem:[%s6954_s3 + $0xf8] sm:$0xf0]  ;;  %v4120_v26 = vor.u32 %v4655_v3, %v4119_v22  ;;  %v4562_v22 = vld [vmem:[%s6954_s3 + $0x4c] sm:$0xf] }
 0x101   :  { %2466 = vmatpush.bf16.msra.mxu1 %v3868_v45  ;;  %v1425_v38 = vpop.f32.mrf.mxu3  ;;  %v6350_v40 = vpop.f32.mrf.mxu0  ;;  %2476 = vmatpush.bf16.msra.mxu2 %v4044_v31  ;;  %v3935_v45 = vld [vmem:[%s6954_s3 + $0x1a8] sm:$0xf]  ;;  %v4592_v31 = vld [vmem:[%s6954_s3 + $0x134] sm:$0xf0]  ;;  %v3761_v3 = vld [vmem:[%s6954_s3 + $0x58] sm:$0xf0] }
 0x102   :  { %2436 = vmatpush.bf16.msrb.mxu0 %v4184_v32  ;;  %v6367_v49 = vpop.f32.mrf.mxu1  ;;  %v3936_v51 = vor.u32 %v4608_v60, %v3935_v45  ;;  %v4103_v38 = vld [vmem:[%s6954_s3 + $0x300] sm:$0xf]  ;;  %v231_v45 = vperm.slane %v5975_v6, 2 }
 0x103   :  { %2453 = vmatpush.bf16.msra.mxu3 %v3740_v42  ;;  %v3952_v42 = vor.u32 %v4612_v30, %v3951_v28  ;;  %v3728_v28 = vor.u32 %v4556_v16, %v3727_v48  ;;  %v3871_v30 = vld [vmem:[%s6954_s3 + $0x128] sm:$0xf]  ;;  %v4566_v48 = vld [vmem:[%s6954_s3 + $0x6c] sm:$0xf]  ;;  %v4169_v16 = vld [vmem:[%s6954_s3 + $0x390] sm:$0xf0] }
 0x105   :  { %2467 = vmatpush.bf16.msra.mxu1 %v3852_v35  ;;  %2477 = vmatpush.bf16.msra.mxu2 %v4028_v44  ;;  %v4152_v35 = vor.u32 %v4663_v56, %v4151_v55  ;;  %v4201_v55 = vld [vmem:[%s6954_s3 + $0x3d0] sm:$0xf0]  ;;  %v1437_v56 = vadd.f32 %v6367_v49, %v231_v45  ;;  %v4570_v49 = vld [vmem:[%s6954_s3 + $0x8c] sm:$0xf]  ;;  %v3905_v45 = vld [vmem:[%s6954_s3 + $0x178] sm:$0xf0] }
 0x106   :  { %2437 = vmatpush.bf16.msrb.mxu0 %v4168_v47  ;;  %v4220_v47 = vor.u32 %v4677_v53, %v4217_v19  ;;  %v4598_v19 = vld [vmem:[%s6954_s3 + $0x16c] sm:$0xf] }
 0x107   :  { %2454 = vmatpush.bf16.msra.mxu3 %v3724_v54  ;;  %v4012_v54 = vor.u32 %v4625_v34, %v4009_v39  ;;  %v3855_v34 = vld [vmem:[%s6954_s3 + $0x108] sm:$0xf]  ;;  %v4588_v39 = vld [vmem:[%s6954_s3 + $0x114] sm:$0xf0] }
 0x109   :  { %2512 = vmatpush.bf16.msrb.mxu1 %v3968_v23  ;;  %v1464_v2 = vpop.f32.mrf.mxu0  ;;  %2478 = vmatpush.bf16.msra.mxu2 %v4012_v54  ;;  %v4596_v23 = vld [vmem:[%s6954_s3 + $0x154] sm:$0xf0]  ;;  %v4673_v54 = vld [vmem:[%s6954_s3 + $0x3c4] sm:$0xf] }
 0x10a   :  { %2455 = vmatmul.bf16.vlgmr.msra.gmra.mxu3 %v6145_v46  ;;  %2438 = vmatpush.bf16.msrb.mxu0 %v4152_v35  ;;  %v1438_v14 = vpop.f32.mrf.mxu1  ;;  %v3888_v32 = vor.u32 %v4596_v23, %v3887_v9  ;;  %v4204_v35 = vor.u32 %v4673_v54, %v4201_v55  ;;  %v3793_v2 = vld [vmem:[%s6954_s3 + $0x98] sm:$0xf0]  ;;  %v4661_v23 = vld [vmem:[%s6954_s3 + $0x364] sm:$0xf]  ;;  %v4121_v55 = vld [vmem:[%s6954_s3 + $0x330] sm:$0xf0] }
 0x10b   :  { %2499 = vmatpush.bf16.msrb.mxu3 %v3840_v58  ;;  %v3919_v58 = vld [vmem:[%s6954_s3 + $0x188] sm:$0xf]  ;;  %v3777_v14 = vld [vmem:[%s6954_s3 + $0x78] sm:$0xf0]  ;;  %v4653_v54 = vld [vmem:[%s6954_s3 + $0x324] sm:$0xf] }
 0x10c   :  { %v3920_v4 = vor.u32 %v4604_v59, %v3919_v58  ;;  %v4614_v58 = vld [vmem:[%s6954_s3 + $0x1ec] sm:$0xf]  ;;  %v3969_v59 = vld [vmem:[%s6954_s3 + $0x1f8] sm:$0xf0] }
 0x10d   :  { %2513 = vmatpush.bf16.msrb.mxu1 %v3952_v42  ;;  %v6402_v1 = vpop.f32.mrf.mxu3  ;;  %v6419_v57 = vpop.f32.mrf.mxu2  ;;  %v4651_v42 = vld [vmem:[%s6954_s3 + $0x30c] sm:$0xf0] }
 0x10e   :  { %2439 = vmatpush.bf16.msrb.mxu0 %v4136_v13  ;;  %v4104_v44 = vor.u32 %v4651_v42, %v4103_v38  ;;  %v3796_v13 = vor.u32 %v4570_v49, %v3793_v2  ;;  %v3745_v42 = vld [vmem:[%s6954_s3 + $0x38] sm:$0xf0]  ;;  %v4644_v2 = vld [vmem:[%s6954_s3 + $0x2d4] sm:$0xf0] }
 0x10f   :  { %2500 = vmatpush.bf16.msrb.mxu3 %v3824_v5  ;;  %v3996_v5 = vor.u32 %v4621_v63, %v3993_v0  ;;  %v3972_v0 = vor.u32 %v4614_v58, %v3969_v59  ;;  %v4594_v58 = vld [vmem:[%s6954_s3 + $0x14c] sm:$0xf]  ;;  %v3889_v59 = vld [vmem:[%s6954_s3 + $0x158] sm:$0xf0] }
 0x110   :  { %2468 = vmatmul.bf16.vlgmr.msra.gmra.mxu1 %v6332_v27 }
 0x111   :  { %2514 = vmatpush.bf16.msrb.mxu1 %v3936_v51  ;;  %2479 = vmatpush.bf16.msra.mxu2 %v3996_v5  ;;  %v6461_v10 = vpop.f32.mrf.mxu0  ;;  %v4574_v51 = vld [vmem:[%s6954_s3 + $0xac] sm:$0xf]  ;;  %v1450_v5 = vadd.f32 %v6402_v1, %v1437_v56  ;;  %v3956_v1 = vor.u32 %v4610_v7, %v3953_v8  ;;  %v4105_v7 = vld [vmem:[%s6954_s3 + $0x310] sm:$0xf0] }
 0x112   :  { %2440 = vmatpush.bf16.msrb.mxu0 %v4120_v26  ;;  %v3812_v62 = vor.u32 %v4574_v51, %v3809_v52  ;;  %v4602_v26 = vld [vmem:[%s6954_s3 + $0x18c] sm:$0xf]  ;;  %v3908_v52 = vor.u32 %v4598_v19, %v3905_v45  ;;  %v4097_v45 = vld [vmem:[%s6954_s3 + $0x2f8] sm:$0xf0] }
 0x113   :  { %2501 = vmatpush.bf16.msrb.mxu3 %v3808_v21  ;;  %v3980_v21 = vor.u32 %v4617_v17, %v3977_v18  ;;  %v1463_v17 = vadd.f32 %v6350_v40, %v1450_v5  ;;  %v4606_v18 = vld [vmem:[%s6954_s3 + $0x1ac] sm:$0xf]  ;;  %v4649_v5 = vld [vmem:[%s6954_s3 + $0x304] sm:$0xf] }
 0x114   :  { %v4554_v51 = vld [vmem:[%s6954_s3 + $0xc] sm:$0xf] }
 0x115   :  { %2515 = vmatpush.bf16.msrb.mxu1 %v3920_v4  ;;  %v1451_v37 = vpop.f32.mrf.mxu3  ;;  %2480 = vmatpush.bf16.msra.mxu2 %v3980_v21  ;;  %v1477_v60 = vpop.f32.mrf.mxu2  ;;  %v4669_v4 = vld [vmem:[%s6954_s3 + $0x3a4] sm:$0xf]  ;;  %v3780_v21 = vor.u32 %v4566_v48, %v3777_v14  ;;  %v4590_v8 = vld [vmem:[%s6954_s3 + $0x12c] sm:$0xf]  ;;  %v4640_v14 = vld [vmem:[%s6954_s3 + $0x2b4] sm:$0xf0] }
 0x116   :  { %2441 = vmatpush.bf16.msrb.mxu0 %v4104_v44  ;;  %v4188_v11 = vor.u32 %v4669_v4, %v4185_v41  ;;  %v4137_v44 = vld [vmem:[%s6954_s3 + $0x350] sm:$0xf0]  ;;  %v3892_v4 = vor.u32 %v4594_v58, %v3889_v59  ;;  %v4646_v19 = vld [vmem:[%s6954_s3 + $0x2ec] sm:$0xf] }
 0x117   :  { %2502 = vmatpush.bf16.msrb.mxu3 %v3792_v33  ;;  %v3844_v33 = vor.u32 %v4582_v24, %v3841_v25  ;;  %v4153_v24 = vld [vmem:[%s6954_s3 + $0x370] sm:$0xf0]  ;;  %v1476_v25 = vadd.f32 %v6419_v57, %v1463_v17  ;;  %v4558_v57 = vld [vmem:[%s6954_s3 + $0x2c] sm:$0xf]  ;;  %v3857_v17 = vld [vmem:[%s6954_s3 + $0x118] sm:$0xf0] }
 0x119   :  { %2516 = vmatpush.bf16.msrb.mxu1 %v3904_v20  ;;  %v1516_v63 = vpop.f32.mrf.mxu0  ;;  %v3937_v20 = vld [vmem:[%s6954_s3 + $0x1b8] sm:$0xf0] }
 0x11a   :  { %2486 = vmatpush.bf16.msra.mxu0 %v4220_v47  ;;  %v3940_v40 = vor.u32 %v4606_v18, %v3937_v20  ;;  %v4140_v47 = vor.u32 %v4657_v43, %v4137_v44  ;;  %v4047_v20 = vld [vmem:[%s6954_s3 + $0x288] sm:$0xf]  ;;  %v4620_v44 = vld [vmem:[%s6954_s3 + $0x214] sm:$0xf0] }
 0x11b   :  { %2503 = vmatpush.bf16.msrb.mxu3 %v3776_v50  ;;  %v3872_v50 = vor.u32 %v4592_v31, %v3871_v30  ;;  %v4156_v31 = vor.u32 %v4661_v23, %v4153_v24  ;;  %v3983_v43 = vld [vmem:[%s6954_s3 + $0x208] sm:$0xf] }
 0x11d   :  { %2517 = vmatpush.bf16.msrb.mxu1 %v3888_v32 }
 0x11e   :  { %2487 = vmatpush.bf16.msra.mxu0 %v4204_v35 }
 0x11f   :  { %2504 = vmatpush.bf16.msrb.mxu3 %v3760_v61  ;;  %v3856_v61 = vor.u32 %v4588_v39, %v3855_v34  ;;  %v4095_v34 = vld [vmem:[%s6954_s3 + $0x2e8] sm:$0xf]  ;;  %v4648_v39 = vld [vmem:[%s6954_s3 + $0x2f4] sm:$0xf0] }
 0x121   :  { %2518 = vmatpush.bf16.msrb.mxu1 %v3872_v50  ;;  %v1488_v12 = vpop.f32.mrf.mxu1 }
 0x122   :  { %2488 = vmatpush.bf16.msra.mxu0 %v4188_v11  ;;  %v1489_v32 = vadd.f32 %v1488_v12, %v1476_v25  ;;  %v3873_v11 = vld [vmem:[%s6954_s3 + $0x138] sm:$0xf0] }
 0x123   :  { %2505 = vmatpush.bf16.msrb.mxu3 %v3744_v15  ;;  %v4665_v15 = vld [vmem:[%s6954_s3 + $0x384] sm:$0xf] }
 0x124   :  { %v4172_v9 = vor.u32 %v4665_v15, %v4169_v16  ;;  %v3876_v15 = vor.u32 %v4590_v8, %v3873_v11  ;;  %v4586_v16 = vld [vmem:[%s6954_s3 + $0x10c] sm:$0xf]  ;;  %v4049_v8 = vld [vmem:[%s6954_s3 + $0x298] sm:$0xf0]  ;;  %v4191_v11 = vld [vmem:[%s6954_s3 + $0x3a8] sm:$0xf] }
 0x125   :  { %2519 = vmatpush.bf16.msrb.mxu1 %v3856_v61  ;;  %v6563_v30 = vpop.f32.mrf.mxu0  ;;  %v4124_v61 = vor.u32 %v4653_v54, %v4121_v55  ;;  %v4223_v54 = vld [vmem:[%s6954_s3 + $0x3e8] sm:$0xf]  ;;  %v4680_v55 = vld [vmem:[%s6954_s3 + $0x3f4] sm:$0xf0] }
 0x126   :  { %2489 = vmatpush.bf16.msra.mxu0 %v4172_v9  ;;  %v4636_v9 = vld [vmem:[%s6954_s3 + $0x294] sm:$0xf0] }
 0x127   :  { %2506 = vmatpush.bf16.msrb.mxu3 %v3728_v28  ;;  %v3921_v28 = vld [vmem:[%s6954_s3 + $0x198] sm:$0xf0] }
 0x128   :  { %2520 = vmatmul.bf16.vlgmr.msrb.gmra.mxu1 %v6332_v27  ;;  %v3924_v38 = vor.u32 %v4602_v26, %v3921_v28  ;;  %v4628_v26 = vld [vmem:[%s6954_s3 + $0x254] sm:$0xf0] }
 0x129   :  { %2564 = vmatpush.bf16.msra.mxu1 %v3972_v0  ;;  %v1490_v36 = vpop.f32.mrf.mxu1  ;;  %v4079_v0 = vld [vmem:[%s6954_s3 + $0x2c8] sm:$0xf] }
 0x12a   :  { %2507 = vmatmul.bf16.vlgmr.msrb.gmra.mxu3 %v6145_v46  ;;  %2490 = vmatpush.bf16.msra.mxu0 %v4156_v31  ;;  %v4080_v48 = vor.u32 %v4644_v2, %v4079_v0  ;;  %v4207_v0 = vld [vmem:[%s6954_s3 + $0x3c8] sm:$0xf]  ;;  %v4676_v2 = vld [vmem:[%s6954_s3 + $0x3d4] sm:$0xf0] }
 0x12b   :  { %2551 = vmatpush.bf16.msra.mxu3 %v3844_v33  ;;  %v3764_v33 = vor.u32 %v4562_v22, %v3761_v3  ;;  %v3860_v22 = vor.u32 %v4586_v16, %v3857_v17  ;;  %v4031_v3 = vld [vmem:[%s6954_s3 + $0x268] sm:$0xf]  ;;  %v4668_v16 = vld [vmem:[%s6954_s3 + $0x394] sm:$0xf0] }
 0x12d   :  { %2565 = vmatpush.bf16.msra.mxu1 %v3956_v1  ;;  %v1501_v37 = vpop.f32.mrf.mxu3  ;;  %v1527_v60 = vpop.f32.mrf.mxu2  ;;  %v4063_v1 = vld [vmem:[%s6954_s3 + $0x2a8] sm:$0xf] }
 0x12e   :  { %v1502_v53 = vadd.f32 %v1501_v37, %v1489_v32  ;;  %v1542_v35 = vpop.f32.mrf.mxu0  ;;  %2491 = vmatpush.bf16.msra.mxu0 %v4140_v47  ;;  %v4064_v18 = vor.u32 %v4640_v14, %v4063_v1  ;;  %v4630_v1 = vld [vmem:[%s6954_s3 + $0x26c] sm:$0xf]  ;;  %v4033_v14 = vld [vmem:[%s6954_s3 + $0x278] sm:$0xf0] }
 0x12f   :  { %2552 = vmatpush.bf16.msra.mxu3 %v3828_v29  ;;  %v3748_v29 = vor.u32 %v4558_v57, %v3745_v42  ;;  %v4224_v35 = vor.u32 %v4680_v55, %v4223_v54  ;;  %v4036_v17 = vor.u32 %v4630_v1, %v4033_v14  ;;  %v4161_v54 = vld [vmem:[%s6954_s3 + $0x378] sm:$0xf0] }
 0x130   :  { %v1515_v50 = vadd.f32 %v6461_v10, %v1502_v53  ;;  %v3729_v10 = vld [vmem:[%s6954_s3 + $0x18] sm:$0xf0] }
 0x131   :  { %2566 = vmatpush.bf16.msra.mxu1 %v3940_v40  ;;  %v3732_v63 = vor.u32 %v4554_v51, %v3729_v10  ;;  %v4048_v40 = vor.u32 %v4636_v9, %v4047_v20  ;;  %v4081_v51 = vld [vmem:[%s6954_s3 + $0x2d8] sm:$0xf0]  ;;  %v4626_v20 = vld [vmem:[%s6954_s3 + $0x24c] sm:$0xf] }
 0x132   :  { %v1611_v56 = vmax.f32 %v1515_v50, 0.0  ;;  %2492 = vmatpush.bf16.msra.mxu0 %v4124_v61  ;;  %v3984_v50 = vor.u32 %v4620_v44, %v3983_v43  ;;  %v4638_v61 = vld [vmem:[%s6954_s3 + $0x2ac] sm:$0xf]  ;;  %v4017_v9 = vld [vmem:[%s6954_s3 + $0x258] sm:$0xf0] }
 0x133   :  { %2553 = vmatpush.bf16.msra.mxu3 %v3812_v62  ;;  %v4096_v62 = vor.u32 %v4648_v39, %v4095_v34  ;;  %v4642_v39 = vld [vmem:[%s6954_s3 + $0x2cc] sm:$0xf]  ;;  %v4225_v43 = vld [vmem:[%s6954_s3 + $0x3f8] sm:$0xf0] }
 0x134   :  { %v6608_v49 = vpack.c.bf16 %v1611_v56, %v1611_v56  ;;  %v4084_v59 = vor.u32 %v4642_v39, %v4081_v51  ;;  %v6806_v39 = vld [vmem:[%s6955_s4] sm:$0xf] }
 0x135   :  { %2567 = vmatpush.bf16.msra.mxu1 %v3924_v38  ;;  %v1503_v41 = vpop.f32.mrf.mxu3  ;;  %v1529_v12 = vpop.f32.mrf.mxu2 }
 0x136   :  { %2429 = vmatmul.bf16.vlgmr.msrb.gmra.mxu2 %v6608_v49  ;;  %v4672_v12 = vld [vmem:[%s6954_s3 + $0x3b4] sm:$0xf0] }
 0x137   :  { %2554 = vmatpush.bf16.msra.mxu3 %v3796_v13  ;;  %v4108_v13 = vor.u32 %v4649_v5, %v4105_v7  ;;  %2525 = vmatpush.bf16.msrb.mxu2 %v4096_v62  ;;  %v4065_v62 = vld [vmem:[%s6954_s3 + $0x2b8] sm:$0xf0]  ;;  %v4208_v5 = vor.u32 %v4676_v2, %v4207_v0  ;;  %v4634_v7 = vld [vmem:[%s6954_s3 + $0x28c] sm:$0xf] }
 0x138   :  { %v4654_v2 = vld [vmem:[%s6954_s3 + $0x32c] sm:$0xf] }
 0x139   :  { %2568 = vmatpush.bf16.msra.mxu1 %v3908_v52  ;;  %2493 = vmatpush.bf16.msra.mxu0 %v4108_v13  ;;  %v4052_v13 = vor.u32 %v4634_v7, %v4049_v8  ;;  %v4113_v7 = vld [vmem:[%s6954_s3 + $0x318] sm:$0xf0] }
 0x13b   :  { %2555 = vmatpush.bf16.msra.mxu3 %v3780_v21  ;;  %2526 = vmatpush.bf16.msrb.mxu2 %v4080_v48  ;;  %v232_v21 = vperm.slane %v5975_v6, 3  ;;  %v4015_v6 = vld [vmem:[%s6954_s3 + $0x248] sm:$0xf]  ;;  %v4192_v48 = vor.u32 %v4672_v12, %v4191_v11 }
 0x13c   :  { %v4016_v32 = vor.u32 %v4628_v26, %v4015_v6 }
 0x13d   :  { %2569 = vmatpush.bf16.msra.mxu1 %v3892_v4  ;;  %v1528_v23 = vadd.f32 %v1527_v60, %v232_v21  ;;  %v4068_v4 = vor.u32 %v4638_v61, %v4065_v62  ;;  %v4159_v21 = vld [vmem:[%s6954_s3 + $0x368] sm:$0xf] }
 0x13f   :  { %2556 = vmatpush.bf16.msra.mxu3 %v3764_v33  ;;  %2527 = vmatpush.bf16.msrb.mxu2 %v4064_v18  ;;  %v1541_v28 = vadd.f32 %v6563_v30, %v1528_v23  ;;  %v3999_v33 = vld [vmem:[%s6954_s3 + $0x228] sm:$0xf]  ;;  %v4001_v23 = vld [vmem:[%s6954_s3 + $0x238] sm:$0xf0] }
 0x141   :  { %2570 = vmatpush.bf16.msra.mxu1 %v3876_v15  ;;  %v1553_v24 = vpop.f32.mrf.mxu1  ;;  %v4175_v15 = vld [vmem:[%s6954_s3 + $0x388] sm:$0xf] }
 0x142   :  { %v1554_v36 = vadd.f32 %v1553_v24, %v1541_v28  ;;  %v4176_v18 = vor.u32 %v4668_v16, %v4175_v15  ;;  %v4143_v24 = vld [vmem:[%s6954_s3 + $0x348] sm:$0xf]  ;;  %v4688_v15 = vld [vmem:[%s6956_s5 + $0x38] sm:$0xff] }
 0x143   :  { %2557 = vmatpush.bf16.msra.mxu3 %v3748_v29  ;;  %2528 = vmatpush.bf16.msrb.mxu2 %v4048_v40  ;;  %v4100_v29 = vor.u32 %v4646_v19, %v4097_v45  ;;  %v4020_v40 = vor.u32 %v4626_v20, %v4017_v9  ;;  %v4674_v19 = vld [vmem:[%s6954_s3 + $0x3cc] sm:$0xf]  ;;  %v4209_v45 = vld [vmem:[%s6954_s3 + $0x3d8] sm:$0xf0] }
 0x145   :  { %2571 = vmatpush.bf16.msra.mxu1 %v3860_v22  ;;  %v1592_v31 = vpop.f32.mrf.mxu0  ;;  %v4664_v22 = vld [vmem:[%s6954_s3 + $0x374] sm:$0xf0] }
 0x146   :  { %2481 = vmatmul.bf16.vlgmr.msra.gmra.mxu2 %v6608_v49 }
 0x147   :  { %2558 = vmatpush.bf16.msra.mxu3 %v3732_v63 }
 0x148   :  { %2572 = vmatmul.bf16.vlgmr.msra.gmra.mxu1 %v6332_v27  ;;  %v4624_v27 = vld [vmem:[%s6954_s3 + $0x234] sm:$0xf0] }
 0x149   :  { %v1555_v57 = vpop.f32.mrf.mxu1  ;;  %v4000_v30 = vor.u32 %v4624_v27, %v3999_v33  ;;  %v4127_v33 = vld [vmem:[%s6954_s3 + $0x328] sm:$0xf]  ;;  %v4656_v27 = vld [vmem:[%s6954_s3 + $0x334] sm:$0xf0] }
 0x14a   :  { %2559 = vmatmul.bf16.vlgmr.msra.gmra.mxu3 %v6145_v46  ;;  %v4632_v46 = vld [vmem:[%s6954_s3 + $0x274] sm:$0xf0]  ;;  %v4128_v57 = vor.u32 %v4656_v27, %v4127_v33  ;;  %v1750_v27 = vperm.slane %v6806_v39, 3 }
 0x14b   :  { %v4032_v25 = vor.u32 %v4632_v46, %v4031_v3  ;;  %v4160_v3 = vor.u32 %v4664_v22, %v4159_v21  ;;  %v4622_v46 = vld [vmem:[%s6954_s3 + $0x22c] sm:$0xf]  ;;  %2871 = vmatpush.bf16.msrb.mxu3 %v4688_v15 }
 0x14c   :  { %v4004_v26 = vor.u32 %v4622_v46, %v4001_v23  ;;  %v4686_v21 = vld [vmem:[%s6956_s5 + $0x28] sm:$0xff]  ;;  %v4684_v46 = vld [vmem:[%s6956_s5 + $0x18] sm:$0xff] }
 0x14d   :  { %2529 = vmatpush.bf16.msrb.mxu2 %v4032_v25  ;;  %v1566_v37 = vpop.f32.mrf.mxu3  ;;  %v1579_v42 = vpop.f32.mrf.mxu2  ;;  %v4660_v25 = vld [vmem:[%s6954_s3 + $0x354] sm:$0xf0] }
 0x14e   :  { %v1567_v38 = vadd.f32 %v1566_v37, %v1554_v36  ;;  %v1594_v60 = vpop.f32.mrf.mxu0  ;;  %v4144_v28 = vor.u32 %v4660_v25, %v4143_v24  ;;  %v4111_v37 = vld [vmem:[%s6954_s3 + $0x308] sm:$0xf]  ;;  %v4696_v23 = vld [vmem:[%s6956_s5 + $0x78] sm:$0xff]  ;;  %v4683_v25 = vld [vmem:[%s6956_s5 + $0x10] sm:$0xff] }
 0x14f   :  { %v4212_v60 = vor.u32 %v4674_v19, %v4209_v45  ;;  %2884 = vmatpush.bf16.msrb.mxu1 %v4696_v23  ;;  %v4690_v19 = vld [vmem:[%s6956_s5 + $0x48] sm:$0xff] }
 0x150   :  { %v1580_v53 = vadd.f32 %v1579_v42, %v1567_v38  ;;  %v4652_v38 = vld [vmem:[%s6954_s3 + $0x314] sm:$0xf0]  ;;  %v4702_v45 = vld [vmem:[%s6956_s5 + $0xa8] sm:$0xff] }
 0x151   :  { %2530 = vmatpush.bf16.msrb.mxu2 %v4016_v32  ;;  %v1605_v34 = vpop.f32.mrf.mxu1  ;;  %v3985_v32 = vld [vmem:[%s6954_s3 + $0x218] sm:$0xf0]  ;;  %v4112_v44 = vor.u32 %v4652_v38, %v4111_v37 }
 0x152   :  { %v1593_v47 = vadd.f32 %v1592_v31, %v1580_v53  ;;  %v4618_v31 = vld [vmem:[%s6954_s3 + $0x20c] sm:$0xf] }
 0x153   :  { %v3988_v36 = vor.u32 %v4618_v31, %v3985_v32  ;;  %v4681_v31 = vld [vmem:[%s6956_s5] sm:$0xff] }
 0x154   :  { %v1606_v52 = vadd.f32 %v1605_v34, %v1593_v47  ;;  %v4670_v47 = vld [vmem:[%s6954_s3 + $0x3ac] sm:$0xf]  ;;  %v4177_v34 = vld [vmem:[%s6954_s3 + $0x398] sm:$0xf0]  ;;  %v4693_v32 = vld [vmem:[%s6956_s5 + $0x60] sm:$0xff] }
 0x155   :  { %2531 = vmatpush.bf16.msrb.mxu2 %v4000_v30  ;;  %v1568_v10 = vpop.f32.mrf.mxu3  ;;  %v1581_v56 = vpop.f32.mrf.mxu2  ;;  %v4678_v30 = vld [vmem:[%s6954_s3 + $0x3ec] sm:$0xf] }
 0x156   :  { %v1612_v58 = vmax.f32 %v1606_v52, 0.0  ;;  %v4228_v53 = vor.u32 %v4678_v30, %v4225_v43  ;;  %v1747_v52 = vperm.slane %v6806_v39, 0  ;;  %v4662_v10 = vld [vmem:[%s6954_s3 + $0x36c] sm:$0xf]  ;;  %v4703_v30 = vld [vmem:[%s6956_s5 + $0xb0] sm:$0xff] }
 0x157   :  { %v4164_v55 = vor.u32 %v4662_v10, %v4161_v54  ;;  %v4698_v10 = vld [vmem:[%s6956_s5 + $0x88] sm:$0xff] }
 0x158   :  { %v6700_v63 = vpack.c.bf16 %v1612_v58, %v1612_v58  ;;  %v4658_v58 = vld [vmem:[%s6954_s3 + $0x34c] sm:$0xf] }
 0x159   :  { %2532 = vmatpush.bf16.msrb.mxu2 %v3984_v50  ;;  %v1607_v41 = vpop.f32.mrf.mxu1  ;;  %v4193_v50 = vld [vmem:[%s6954_s3 + $0x3b8] sm:$0xf0] }
 0x15a   :  { %2442 = vmatmul.bf16.vlgmr.msrb.gmra.mxu0 %v6700_v63 }
 0x15b   :  { %2538 = vmatpush.bf16.msrb.mxu0 %v4224_v35 }
 0x15c   :  { %2533 = vmatmul.bf16.vlgmr.msrb.gmra.mxu2 %v6608_v49 }
 0x15d   :  { %2577 = vmatpush.bf16.msra.mxu2 %v4100_v29  ;;  %v4666_v29 = vld [vmem:[%s6954_s3 + $0x38c] sm:$0xf] }
 0x15e   :  { %v4180_v51 = vor.u32 %v4666_v29, %v4177_v34  ;;  %v4700_v34 = vld [vmem:[%s6956_s5 + $0x98] sm:$0xff] }
 0x15f   :  { %2539 = vmatpush.bf16.msrb.mxu0 %v4208_v5  ;;  %v4650_v5 = vld [vmem:[%s6954_s3 + $0x30c] sm:$0xf] }
 0x160   :  { %v4116_v12 = vor.u32 %v4650_v5, %v4113_v7 }
 0x161   :  { %2578 = vmatpush.bf16.msra.mxu2 %v4084_v59  ;;  %v4145_v59 = vld [vmem:[%s6954_s3 + $0x358] sm:$0xf0] }
 0x162   :  { %v4148_v0 = vor.u32 %v4658_v58, %v4145_v59  ;;  %v4697_v58 = vld [vmem:[%s6956_s5 + $0x80] sm:$0xff]  ;;  %v4712_v59 = vld [vmem:[%s6956_s5 + $0xf8] sm:$0xff] }
 0x163   :  { %2540 = vmatpush.bf16.msrb.mxu0 %v4192_v48 }
 0x165   :  { %2579 = vmatpush.bf16.msra.mxu2 %v4068_v4  ;;  %v4129_v4 = vld [vmem:[%s6954_s3 + $0x338] sm:$0xf0] }
 0x166   :  { %v4132_v41 = vor.u32 %v4654_v2, %v4129_v4  ;;  %v4710_v2 = vld [vmem:[%s6956_s5 + $0xe8] sm:$0xff] }
 0x167   :  { %2541 = vmatpush.bf16.msrb.mxu0 %v4176_v18  ;;  %v4687_v18 = vld [vmem:[%s6956_s5 + $0x30] sm:$0xff] }
 0x168   :  { %2872 = vmatpush.bf16.msrb.mxu3 %v4687_v18 }
 0x169   :  { %2580 = vmatpush.bf16.msra.mxu2 %v4052_v13  ;;  %v1748_v13 = vperm.slane %v6806_v39, 1 }
 0x16a   :  { %2494 = vmatmul.bf16.vlgmr.msra.gmra.mxu0 %v6700_v63 }
 0x16b   :  { %2542 = vmatpush.bf16.msrb.mxu0 %v4160_v3 }
 0x16c   :  { %2873 = vmatpush.bf16.msrb.mxu3 %v4686_v21 }
 0x16d   :  { %2581 = vmatpush.bf16.msra.mxu2 %v4036_v17  ;;  %v2404_v6 = vpop.f32.mrf.mxu3  ;;  %v1749_v17 = vperm.slane %v6806_v39, 2  ;;  %v4699_v39 = vld [vmem:[%s6956_s5 + $0x90] sm:$0xff] }
 0x16e   :  { %v2405_v56 = vadd.f32 %v2404_v6, %v1747_v52  ;;  %v4695_v6 = vld [vmem:[%s6956_s5 + $0x70] sm:$0xff] }
 0x16f   :  { %2543 = vmatpush.bf16.msrb.mxu0 %v4144_v28  ;;  %2885 = vmatpush.bf16.msrb.mxu1 %v4695_v6  ;;  %v4694_v28 = vld [vmem:[%s6956_s5 + $0x68] sm:$0xff] }
 0x171   :  { %2582 = vmatpush.bf16.msra.mxu2 %v4020_v40  ;;  %v4685_v40 = vld [vmem:[%s6956_s5 + $0x20] sm:$0xff] }
 0x172   :  { %2874 = vmatpush.bf16.msrb.mxu3 %v4685_v40 }
 0x173   :  { %2544 = vmatpush.bf16.msrb.mxu0 %v4128_v57  ;;  %2886 = vmatpush.bf16.msrb.mxu1 %v4694_v28  ;;  %v4704_v57 = vld [vmem:[%s6956_s5 + $0xb8] sm:$0xff] }
 0x175   :  { %2583 = vmatpush.bf16.msra.mxu2 %v4004_v26  ;;  %v2406_v42 = vpop.f32.mrf.mxu3  ;;  %v4682_v26 = vld [vmem:[%s6956_s5 + $0x8] sm:$0xff] }
 0x176   :  { %2875 = vmatpush.bf16.msrb.mxu3 %v4684_v46  ;;  %v4691_v42 = vld [vmem:[%s6956_s5 + $0x50] sm:$0xff] }
 0x177   :  { %2545 = vmatpush.bf16.msrb.mxu0 %v4112_v44  ;;  %2887 = vmatpush.bf16.msrb.mxu1 %v4693_v32 }
 0x179   :  { %2584 = vmatpush.bf16.msra.mxu2 %v3988_v36  ;;  %v4692_v36 = vld [vmem:[%s6956_s5 + $0x58] sm:$0xff] }
 0x17a   :  { %2546 = vmatmul.bf16.vlgmr.msrb.gmra.mxu0 %v6700_v63  ;;  %2876 = vmatpush.bf16.msrb.mxu3 %v4683_v25 }
 0x17b   :  { %2590 = vmatpush.bf16.msra.mxu0 %v4228_v53  ;;  %2888 = vmatpush.bf16.msrb.mxu1 %v4692_v36 }
 0x17c   :  { %2585 = vmatmul.bf16.vlgmr.msra.gmra.mxu2 %v6608_v49  ;;  %v4196_v49 = vor.u32 %v4670_v47, %v4193_v50  ;;  %v4689_v47 = vld [vmem:[%s6956_s5 + $0x40] sm:$0xff] }
 0x17d   :  { %v2417_v35 = vpop.f32.mrf.mxu1  ;;  %2897 = vmatpush.bf16.msrb.mxu2 %v4704_v57  ;;  %v4701_v50 = vld [vmem:[%s6956_s5 + $0xa0] sm:$0xff] }
 0x17e   :  { %v6821_v62 = vadd.f32 %v2417_v35, %v2405_v56  ;;  %2877 = vmatpush.bf16.msrb.mxu3 %v4682_v26 }
 0x17f   :  { %2591 = vmatpush.bf16.msra.mxu0 %v4212_v60  ;;  %2889 = vmatpush.bf16.msrb.mxu1 %v4691_v42 }
 0x181   :  { %2898 = vmatpush.bf16.msrb.mxu2 %v4703_v30 }
 0x182   :  { %2878 = vmatpush.bf16.msrb.mxu3 %v4681_v31 }
 0x183   :  { %2592 = vmatpush.bf16.msra.mxu0 %v4196_v49  ;;  %2890 = vmatpush.bf16.msrb.mxu1 %v4690_v19 }
 0x185   :  { %v2419_v8 = vpop.f32.mrf.mxu1  ;;  %2899 = vmatpush.bf16.msrb.mxu2 %v4702_v45 }
 0x187   :  { %2593 = vmatpush.bf16.msra.mxu0 %v4180_v51  ;;  %2891 = vmatpush.bf16.msrb.mxu1 %v4689_v47 }
 0x189   :  { %2900 = vmatpush.bf16.msrb.mxu2 %v4701_v50 }
 0x18b   :  { %2594 = vmatpush.bf16.msra.mxu0 %v4164_v55 }
 0x18d   :  { %v2456_v61 = vpop.f32.mrf.mxu3  ;;  %v2469_v1 = vpop.f32.mrf.mxu1  ;;  %2901 = vmatpush.bf16.msrb.mxu2 %v4700_v34 }
 0x18e   :  { %v2457_v48 = vadd.f32 %v2456_v61, %v1748_v13 }
 0x18f   :  { %2595 = vmatpush.bf16.msra.mxu0 %v4148_v0 }
 0x190   :  { %v6836_v14 = vadd.f32 %v2469_v1, %v2457_v48  ;;  %v4707_v48 = vld [vmem:[%s6956_s5 + $0xd0] sm:$0xff] }
 0x191   :  { %2902 = vmatpush.bf16.msrb.mxu2 %v4699_v39 }
 0x193   :  { %2596 = vmatpush.bf16.msra.mxu0 %v4132_v41  ;;  %v4709_v41 = vld [vmem:[%s6956_s5 + $0xe0] sm:$0xff] }
 0x195   :  { %v2458_v11 = vpop.f32.mrf.mxu3  ;;  %v2471_v16 = vpop.f32.mrf.mxu1  ;;  %2903 = vmatpush.bf16.msrb.mxu2 %v4698_v10 }
 0x196   :  { %v4708_v11 = vld [vmem:[%s6956_s5 + $0xd8] sm:$0xff]  ;;  %v4705_v16 = vld [vmem:[%s6956_s5 + $0xc0] sm:$0xff] }
 0x197   :  { %2597 = vmatpush.bf16.msra.mxu0 %v4116_v12 }
 0x199   :  { %2904 = vmatpush.bf16.msrb.mxu2 %v4697_v58 }
 0x19a   :  { %2598 = vmatmul.bf16.vlgmr.msra.gmra.mxu0 %v6700_v63 }
 0x19b   :  { %2910 = vmatpush.bf16.msrb.mxu0 %v4712_v59 }
 0x1a5   :  { %v2521_v63 = vpop.f32.mrf.mxu1 }
 0x1ad   :  { %v2508_v20 = vpop.f32.mrf.mxu3  ;;  %v2523_v24 = vpop.f32.mrf.mxu1 }
 0x1ae   :  { %v2509_v9 = vadd.f32 %v2508_v20, %v1749_v17 }
 0x1b0   :  { %v6849_v22 = vadd.f32 %v2521_v63, %v2509_v9 }
 0x1b5   :  { %v2510_v3 = vpop.f32.mrf.mxu3 }
 0x1b9   :  { %v2430_v33 = vpop.f32.mrf.mxu2 }
 0x1ba   :  { %v2431_v52 = vadd.f32 %v2430_v33, %v6821_v62  ;;  %v4711_v62 = vld [vmem:[%s6956_s5 + $0xf0] sm:$0xff] }
 0x1bb   :  { %2911 = vmatpush.bf16.msrb.mxu0 %v4711_v62 }
 0x1bf   :  { %2912 = vmatpush.bf16.msrb.mxu0 %v4710_v2 }
 0x1c1   :  { %v2432_v44 = vpop.f32.mrf.mxu2 }
 0x1c3   :  { %2913 = vmatpush.bf16.msrb.mxu0 %v4709_v41 }
 0x1c5   :  { %v2573_v43 = vpop.f32.mrf.mxu1 }
 0x1c7   :  { %2914 = vmatpush.bf16.msrb.mxu0 %v4708_v11 }
 0x1c9   :  { %v2482_v29 = vpop.f32.mrf.mxu2 }
 0x1ca   :  { %v2483_v5 = vadd.f32 %v2482_v29, %v6836_v14  ;;  %v4706_v14 = vld [vmem:[%s6956_s5 + $0xc8] sm:$0xff] }
 0x1cb   :  { %2915 = vmatpush.bf16.msrb.mxu0 %v4707_v48 }
 0x1cd   :  { %v2560_v37 = vpop.f32.mrf.mxu3  ;;  %v2575_v49 = vpop.f32.mrf.mxu1 }
 0x1ce   :  { %v2561_v38 = vadd.f32 %v2560_v37, %v1750_v27  ;;  %v4713_v27 = vld [vmem:[%s6957_s6] ss:$0 sm:$0xff] }
 0x1cf   :  { %2916 = vmatpush.bf16.msrb.mxu0 %v4706_v14 }
 0x1d0   :  { %v6891_v53 = vadd.f32 %v2573_v43, %v2561_v38 }
 0x1d1   :  { %v2484_v51 = vpop.f32.mrf.mxu2 }
 0x1d3   :  { %2917 = vmatpush.bf16.msrb.mxu0 %v4705_v16 }
 0x1d5   :  { %v2562_v60 = vpop.f32.mrf.mxu3 }
 0x1d7   :  { %v2443_v54 = vpop.f32.mrf.mxu0 }
 0x1d8   :  { %v2444_v55 = vadd.f32 %v2443_v54, %v2431_v52 }
 0x1da   :  { %v2603_v56 = vmax.f32 %v2444_v55, 0.0 }
 0x1dc   :  { %v2607_v61 = vpack.c.bf16 %v2603_v56, %v2603_v56 }
 0x1de   :  { %2879 = vmatmul.bf16.vlgmr.msrb.gmra.mxu3 %v2607_v61 }
 0x1df   :  { %v2534_v35 = vpop.f32.mrf.mxu2  ;;  %v2445_v0 = vpop.f32.mrf.mxu0 }
 0x1e0   :  { %v2535_v15 = vadd.f32 %v2534_v35, %v6849_v22 }
 0x1e7   :  { %v2536_v4 = vpop.f32.mrf.mxu2  ;;  %v2495_v7 = vpop.f32.mrf.mxu0 }
 0x1e8   :  { %v2496_v8 = vadd.f32 %v2495_v7, %v2483_v5 }
 0x1ea   :  { %v2604_v12 = vmax.f32 %v2496_v8, 0.0 }
 0x1ec   :  { %v2608_v13 = vpack.c.bf16 %v2604_v12, %v2604_v12 }
 0x1ee   :  { %2892 = vmatmul.bf16.vlgmr.msrb.gmra.mxu1 %v2608_v13 }
 0x1ef   :  { %v2497_v1 = vpop.f32.mrf.mxu0 }
 0x1f7   :  { %v2547_v17 = vpop.f32.mrf.mxu0 }
 0x1f8   :  { %v2548_v18 = vadd.f32 %v2547_v17, %v2535_v15 }
 0x1fa   :  { %v2605_v9 = vmax.f32 %v2548_v18, 0.0 }
 0x1fc   :  { %v2609_v21 = vpack.c.bf16 %v2605_v9, %v2605_v9 }
 0x1fe   :  { %2905 = vmatmul.bf16.vlgmr.msrb.gmra.mxu2 %v2609_v21 }
 0x1ff   :  { %v2586_v20 = vpop.f32.mrf.mxu2  ;;  %v2549_v63 = vpop.f32.mrf.mxu0 }
 0x200   :  { %v2587_v3 = vadd.f32 %v2586_v20, %v6891_v53 }
 0x207   :  { %v2588_v40 = vpop.f32.mrf.mxu2 }
 0x217   :  { %v2599_v46 = vpop.f32.mrf.mxu0 }
 0x218   :  { %v2600_v23 = vadd.f32 %v2599_v46, %v2587_v3 }
 0x21a   :  { %v2606_v24 = vmax.f32 %v2600_v23, 0.0 }
 0x21c   :  { %v2610_v25 = vpack.c.bf16 %v2606_v24, %v2606_v24 }
 0x21e   :  { %2918 = vmatmul.bf16.vlgmr.msrb.gmra.mxu0 %v2610_v25 }
 0x21f   :  { %v2601_v22 = vpop.f32.mrf.mxu0 }
 0x261   :  { %v2880_v6 = vpop.f32.mrf.mxu3 }
 0x262   :  { %v2881_v36 = vadd.f32 %v4713_v27, %v2880_v6 }
 0x269   :  { %v2882_v26 = vpop.f32.mrf.mxu3 }
 0x26b   :  { %v2893_v28 = vpop.f32.mrf.mxu1 }
 0x26c   :  { %v2894_v57 = vadd.f32 %v2893_v28, %v2881_v36 }
 0x273   :  { %v2895_v31 = vpop.f32.mrf.mxu1 }
 0x281   :  { %v2906_v32 = vpop.f32.mrf.mxu2 }
 0x282   :  { %v2907_v37 = vadd.f32 %v2906_v32, %v2894_v57 }
 0x289   :  { %v2908_v33 = vpop.f32.mrf.mxu2 }
 0x29b   :  { %v2919_v38 = vpop.f32.mrf.mxu0 }
 0x29c   :  { %v2920_v42 = vadd.f32 %v2919_v38, %v2907_v37 }
 0x29e   :  { %v2923_v30 = vmax.f32 %v2920_v42, 0.0 }
 0x2a0   :  { %2924 = vst [vmem:[%s6958_s7] sm:$0xff] %v2923_v30 }
 0x2a3   :  { %v2921_v43 = vpop.f32.mrf.mxu0 }

</bundles_post_ra>
